<compile_context>
chip_gen: v7x
topology: tpu7x:2x2x1
jax: 0.10.0
libtpu: 0.0.40
codegen_flags: <defaults>
</compile_context>

<pallas_src>
import jax
import jax.numpy as jnp
from jax.experimental import pallas as pl
from jax.experimental.pallas import tpu as pltpu

INPUT_DIM = 256           # TODO(synk): `input_dim` undefined in the PyTorch source; fixed to 256.
HIDDEN = 800
LATENT = 50

HIDDEN_PAD = 896          # 7 * 128 lanes (zero-padded, exact)
LATENT_PAD = 64           # per-head pad; mu|logvar packed into one 128-wide slab

TILE_B = 8                # batch rows per grid step (sublane multiple)


def vecbern_kernel(
    x_ref, eps_ref,
    w1_ref, b1_ref,
    wml_ref, bml_ref,
    w3_ref, b3_ref,
    w4_ref, b4_ref,
    recon_ref, mulv_ref,
):
    x = x_ref[...]                         # (TB, INPUT_DIM)  f32
    eps = eps_ref[...]                     # (TB, LATENT_PAD) f32, zero in padded lanes

    # ---- encode: h1 = relu(x @ W1 + b1)  (bf16 MXU inputs, f32 accumulate) ----
    h1 = jnp.dot(x.astype(jnp.bfloat16), w1_ref[...],
                 preferred_element_type=jnp.float32) + b1_ref[...]
    h1 = jnp.maximum(h1, 0.0)

    # ---- fused mu/logvar projection: one lane-dense (HIDDEN_PAD, 128) matmul ----
    mulv = jnp.dot(h1.astype(jnp.bfloat16), wml_ref[...],
                   preferred_element_type=jnp.float32) + bml_ref[...]
    mu = mulv[:, :LATENT_PAD]              # lanes [0, 64)   (valid: [0, 50))
    logvar = mulv[:, LATENT_PAD:]          # lanes [64, 128) (valid: [64, 114))

    # ---- reparameterize (training mode): z = eps * exp(0.5*logvar) + mu  (f32) ----
    std = jnp.exp(0.5 * logvar)            # padded lanes: exp(0) = 1
    z = eps * std + mu                     # padded lanes: 0*1 + 0 = 0  (exact)

    # ---- decode ----
    h3 = jnp.dot(z.astype(jnp.bfloat16), w3_ref[...],
                 preferred_element_type=jnp.float32) + b3_ref[...]
    h3 = jnp.maximum(h3, 0.0)
    logits = jnp.dot(h3.astype(jnp.bfloat16), w4_ref[...],
                     preferred_element_type=jnp.float32) + b4_ref[...]

    recon_ref[...] = jax.nn.sigmoid(logits)   # (TB, 256)  lane-dense store
    mulv_ref[...] = mulv                      # (TB, 128)  lane-dense packed mu|logvar


def _row_map(i):
    return (i, 0)


def _const_map(i):
    return (0, 0)


def vecbern_forward(x, eps, packed):
    """x: (B, INPUT_DIM) f32, eps: (B, LATENT) f32, packed: output of pack_params()."""
    B, D = x.shape
    assert D == INPUT_DIM and B % TILE_B == 0

    # zero-pad eps to the padded latent width (padded lanes must be exactly 0)
    eps_pad = jnp.zeros((B, LATENT_PAD), jnp.float32).at[:, :LATENT].set(eps)

    operands = (
        x, eps_pad,
        packed["w1"], packed["b1"],
        packed["wml"], packed["bml"],
        packed["w3"], packed["b3"],
        packed["w4"], packed["b4"],
    )

    in_specs = [
        pl.BlockSpec((TILE_B, INPUT_DIM), _row_map),     # x: one microbatch per step
        pl.BlockSpec((TILE_B, LATENT_PAD), _row_map),    # eps
    ] + [
        # full-array weight/bias blocks with constant index_map -> loaded once,
        # not re-DMA'd between grid steps.
        pl.BlockSpec(op.shape, _const_map) for op in operands[2:]
    ]

    out_shape = (
        jax.ShapeDtypeStruct((B, INPUT_DIM), jnp.float32),        # reconstruction
        jax.ShapeDtypeStruct((B, 2 * LATENT_PAD), jnp.float32),   # packed mu|logvar
    )
    out_specs = (
        pl.BlockSpec((TILE_B, INPUT_DIM), _row_map),
        pl.BlockSpec((TILE_B, 2 * LATENT_PAD), _row_map),
    )

    recon, mulv = pl.pallas_call(
        vecbern_kernel,
        grid=(B // TILE_B,),
        out_shape=out_shape,
        in_specs=in_specs,
        out_specs=out_specs,
        compiler_params=pltpu.CompilerParams(
            dimension_semantics=("parallel",),      # megacore-shard microbatches (v7x)
            vmem_limit_bytes=16 << 20,              # kernel needs ~2-3 MiB; leave headroom
        ),
    )(*operands)

    mu = mulv[:, :LATENT]
    logvar = mulv[:, LATENT_PAD:LATENT_PAD + LATENT]
    return recon, mu, logvar


def init_params(key):
    """nn.Linear-style init; weights stored pre-transposed as (in_features, out_features)."""
    def linear(k, fan_in, fan_out):
        kw, kb = jax.random.split(k)
        bound = 1.0 / jnp.sqrt(fan_in)
        w = jax.random.uniform(kw, (fan_in, fan_out), jnp.float32, -bound, bound)
        b = jax.random.uniform(kb, (1, fan_out), jnp.float32, -bound, bound)
        return w, b

    k1, k21, k22, k3, k4 = jax.random.split(key, 5)
    w1, b1 = linear(k1, INPUT_DIM, HIDDEN)
    w21, b21 = linear(k21, HIDDEN, LATENT)
    w22, b22 = linear(k22, HIDDEN, LATENT)
    w3, b3 = linear(k3, LATENT, HIDDEN)
    w4, b4 = linear(k4, HIDDEN, INPUT_DIM)
    return dict(w1=w1, b1=b1, w21=w21, b21=b21, w22=w22, b22=b22,
                w3=w3, b3=b3, w4=w4, b4=b4)


def pack_params(p):
    """Zero-pad to lane-aligned shapes, fuse the mu/logvar heads, cast weights to bf16."""
    f32, bf16 = jnp.float32, jnp.bfloat16

    # fc1: (INPUT_DIM, HIDDEN) -> (INPUT_DIM, HIDDEN_PAD), padded cols/bias = 0
    w1 = jnp.zeros((INPUT_DIM, HIDDEN_PAD), f32).at[:, :HIDDEN].set(p["w1"])
    b1 = jnp.zeros((1, HIDDEN_PAD), f32).at[:, :HIDDEN].set(p["b1"])

    # fused fc21/fc22: mu weights in lanes [0,50), logvar weights in lanes [64,114)
    wml = jnp.zeros((HIDDEN_PAD, 2 * LATENT_PAD), f32)
    wml = wml.at[:HIDDEN, :LATENT].set(p["w21"])
    wml = wml.at[:HIDDEN, LATENT_PAD:LATENT_PAD + LATENT].set(p["w22"])
    bml = jnp.zeros((1, 2 * LATENT_PAD), f32)
    bml = bml.at[:, :LATENT].set(p["b21"])
    bml = bml.at[:, LATENT_PAD:LATENT_PAD + LATENT].set(p["b22"])

    # fc3: (LATENT, HIDDEN) -> (LATENT_PAD, HIDDEN_PAD)
    w3 = jnp.zeros((LATENT_PAD, HIDDEN_PAD), f32).at[:LATENT, :HIDDEN].set(p["w3"])
    b3 = jnp.zeros((1, HIDDEN_PAD), f32).at[:, :HIDDEN].set(p["b3"])

    # fc4: (HIDDEN, INPUT_DIM) -> (HIDDEN_PAD, INPUT_DIM); padded rows hit h3's zero cols
    w4 = jnp.zeros((HIDDEN_PAD, INPUT_DIM), f32).at[:HIDDEN, :].set(p["w4"])
    b4 = p["b4"]

    return dict(
        w1=w1.astype(bf16), b1=b1,
        wml=wml.astype(bf16), bml=bml,
        w3=w3.astype(bf16), b3=b3,
        w4=w4.astype(bf16), b4=b4,
    )


def reference_forward(x, eps, packed):
    """Pure-JAX reference using the same packed bf16/padded params as the kernel."""
    f32, bf16 = jnp.float32, jnp.bfloat16
    eps_pad = jnp.zeros((x.shape[0], LATENT_PAD), f32).at[:, :LATENT].set(eps)
    h1 = jnp.maximum(
        jnp.dot(x.astype(bf16), packed["w1"], preferred_element_type=f32) + packed["b1"], 0.0)
    mulv = jnp.dot(h1.astype(bf16), packed["wml"], preferred_element_type=f32) + packed["bml"]
    mu, logvar = mulv[:, :LATENT_PAD], mulv[:, LATENT_PAD:]
    z = eps_pad * jnp.exp(0.5 * logvar) + mu
    h3 = jnp.maximum(
        jnp.dot(z.astype(bf16), packed["w3"], preferred_element_type=f32) + packed["b3"], 0.0)
    recon = jax.nn.sigmoid(
        jnp.dot(h3.astype(bf16), packed["w4"], preferred_element_type=f32) + packed["b4"])
    return recon, mu[:, :LATENT], logvar[:, :LATENT]


if __name__ == "__main__":
    key = jax.random.PRNGKey(0)
    kx, keps, kp = jax.random.split(key, 3)

    B = 16                                                         # 2 microbatches of TILE_B=8
    x = jax.random.uniform(kx, (B, INPUT_DIM), jnp.float32)        # binarized/normalized input
    eps = jax.random.normal(keps, (B, LATENT), jnp.float32)        # deterministic reparam noise
    params = pack_params(init_params(kp))

    recon, mu, logvar = vecbern_forward(x, eps, params)
    jax.block_until_ready((recon, mu, logvar))

    # correctness check against plain-JAX reference (same bf16-quantized weights)
    r_ref, mu_ref, lv_ref = reference_forward(x, eps, params)
    assert jnp.allclose(recon, r_ref, atol=2e-3, rtol=2e-3)
    assert jnp.allclose(mu, mu_ref, atol=2e-3, rtol=2e-3)
    assert jnp.allclose(logvar, lv_ref, atol=2e-3, rtol=2e-3)

    print("KERNEL_OK")
</pallas_src>

<mosaic_0001>
module attributes {stable_mosaic.version = 11 : i64} {
  func.func @vecbern_kernel(%arg0: i32, %arg1: memref<8x256xf32, #tpu.memory_space<vmem>>, %arg2: memref<8x64xf32, #tpu.memory_space<vmem>>, %arg3: memref<256x896xbf16, #tpu.memory_space<vmem>>, %arg4: memref<1x896xf32, #tpu.memory_space<vmem>>, %arg5: memref<896x128xbf16, #tpu.memory_space<vmem>>, %arg6: memref<1x128xf32, #tpu.memory_space<vmem>>, %arg7: memref<64x896xbf16, #tpu.memory_space<vmem>>, %arg8: memref<1x896xf32, #tpu.memory_space<vmem>>, %arg9: memref<896x256xbf16, #tpu.memory_space<vmem>>, %arg10: memref<1x256xf32, #tpu.memory_space<vmem>>, %arg11: memref<8x256xf32, #tpu.memory_space<vmem>>, %arg12: memref<8x128xf32, #tpu.memory_space<vmem>>) attributes {dimension_semantics = [#tpu.dimension_semantics<parallel>], iteration_bounds = array<i64: 2>, scalar_prefetch = 0 : i64, scratch_operands = 0 : i64, tpu.core_type = #tpu.core_type<tc>, window_params = [{transform_indices = @transform_0, window_bounds = array<i64: 8, 256>}, {transform_indices = @transform_1, window_bounds = array<i64: 8, 64>}, {pipeline_mode = #tpu.pipeline_mode<synchronous>, transform_indices = @transform_2, window_bounds = array<i64: 256, 896>}, {pipeline_mode = #tpu.pipeline_mode<synchronous>, transform_indices = @transform_3, window_bounds = array<i64: 1, 896>}, {pipeline_mode = #tpu.pipeline_mode<synchronous>, transform_indices = @transform_4, window_bounds = array<i64: 896, 128>}, {pipeline_mode = #tpu.pipeline_mode<synchronous>, transform_indices = @transform_5, window_bounds = array<i64: 1, 128>}, {pipeline_mode = #tpu.pipeline_mode<synchronous>, transform_indices = @transform_6, window_bounds = array<i64: 64, 896>}, {pipeline_mode = #tpu.pipeline_mode<synchronous>, transform_indices = @transform_7, window_bounds = array<i64: 1, 896>}, {pipeline_mode = #tpu.pipeline_mode<synchronous>, transform_indices = @transform_8, window_bounds = array<i64: 896, 256>}, {pipeline_mode = #tpu.pipeline_mode<synchronous>, transform_indices = @transform_9, window_bounds = array<i64: 1, 256>}, {transform_indices = @transform_10, window_bounds = array<i64: 8, 256>}, {transform_indices = @transform_11, window_bounds = array<i64: 8, 128>}]} {
    %c0 = arith.constant 0 : index
    %c0_0 = arith.constant 0 : index
    %0 = vector.load %arg1[%c0, %c0_0] : memref<8x256xf32, #tpu.memory_space<vmem>>, vector<8x256xf32>
    %c0_1 = arith.constant 0 : index
    %c0_2 = arith.constant 0 : index
    %1 = vector.load %arg2[%c0_1, %c0_2] : memref<8x64xf32, #tpu.memory_space<vmem>>, vector<8x64xf32>
    %2 = arith.truncf %0 : vector<8x256xf32> to vector<8x256xbf16>
    %c0_3 = arith.constant 0 : index
    %c0_4 = arith.constant 0 : index
    %3 = vector.load %arg3[%c0_3, %c0_4] : memref<256x896xbf16, #tpu.memory_space<vmem>>, vector<256x896xbf16>
    %cst = arith.constant dense<0.000000e+00> : vector<8x896xf32>
    %4 = tpu.matmul %2, %3, %cst {dimension_numbers = #tpu.dot_dimension_numbers<[1], [0], [0], [1], [0, 0, 1, 1], [], []>} : vector<8x256xbf16>, vector<256x896xbf16>, vector<8x896xf32> -> vector<8x896xf32>
    %c0_5 = arith.constant 0 : index
    %c0_6 = arith.constant 0 : index
    %5 = vector.load %arg4[%c0_5, %c0_6] : memref<1x896xf32, #tpu.memory_space<vmem>>, vector<1x896xf32>
    %6 = vector.broadcast %5 : vector<1x896xf32> to vector<8x896xf32>
    %7 = arith.addf %4, %6 : vector<8x896xf32>
    %cst_7 = arith.constant 0.000000e+00 : f32
    %8 = vector.broadcast %cst_7 : f32 to vector<8x896xf32>
    %9 = arith.maximumf %7, %8 : vector<8x896xf32>
    %10 = arith.truncf %9 : vector<8x896xf32> to vector<8x896xbf16>
    %c0_8 = arith.constant 0 : index
    %c0_9 = arith.constant 0 : index
    %11 = vector.load %arg5[%c0_8, %c0_9] : memref<896x128xbf16, #tpu.memory_space<vmem>>, vector<896x128xbf16>
    %cst_10 = arith.constant dense<0.000000e+00> : vector<8x128xf32>
    %12 = tpu.matmul %10, %11, %cst_10 {dimension_numbers = #tpu.dot_dimension_numbers<[1], [0], [0], [1], [0, 0, 1, 1], [], []>} : vector<8x896xbf16>, vector<896x128xbf16>, vector<8x128xf32> -> vector<8x128xf32>
    %c0_11 = arith.constant 0 : index
    %c0_12 = arith.constant 0 : index
    %13 = vector.load %arg6[%c0_11, %c0_12] : memref<1x128xf32, #tpu.memory_space<vmem>>, vector<1x128xf32>
    %14 = vector.broadcast %13 : vector<1x128xf32> to vector<8x128xf32>
    %15 = arith.addf %12, %14 : vector<8x128xf32>
    %16 = vector.extract_strided_slice %15 {offsets = [0, 0], sizes = [8, 64], strides = [1, 1]} : vector<8x128xf32> to vector<8x64xf32>
    %17 = vector.extract_strided_slice %15 {offsets = [0, 64], sizes = [8, 64], strides = [1, 1]} : vector<8x128xf32> to vector<8x64xf32>
    %cst_13 = arith.constant 5.000000e-01 : f32
    %18 = vector.broadcast %cst_13 : f32 to vector<8x64xf32>
    %19 = arith.mulf %18, %17 : vector<8x64xf32>
    %20 = math.exp %19 : vector<8x64xf32>
    %21 = arith.mulf %1, %20 : vector<8x64xf32>
    %22 = arith.addf %21, %16 : vector<8x64xf32>
    %23 = arith.truncf %22 : vector<8x64xf32> to vector<8x64xbf16>
    %c0_14 = arith.constant 0 : index
    %c0_15 = arith.constant 0 : index
    %24 = vector.load %arg7[%c0_14, %c0_15] : memref<64x896xbf16, #tpu.memory_space<vmem>>, vector<64x896xbf16>
    %cst_16 = arith.constant dense<0.000000e+00> : vector<8x896xf32>
    %25 = tpu.matmul %23, %24, %cst_16 {dimension_numbers = #tpu.dot_dimension_numbers<[1], [0], [0], [1], [0, 0, 1, 1], [], []>} : vector<8x64xbf16>, vector<64x896xbf16>, vector<8x896xf32> -> vector<8x896xf32>
    %c0_17 = arith.constant 0 : index
    %c0_18 = arith.constant 0 : index
    %26 = vector.load %arg8[%c0_17, %c0_18] : memref<1x896xf32, #tpu.memory_space<vmem>>, vector<1x896xf32>
    %27 = vector.broadcast %26 : vector<1x896xf32> to vector<8x896xf32>
    %28 = arith.addf %25, %27 : vector<8x896xf32>
    %cst_19 = arith.constant 0.000000e+00 : f32
    %29 = vector.broadcast %cst_19 : f32 to vector<8x896xf32>
    %30 = arith.maximumf %28, %29 : vector<8x896xf32>
    %31 = arith.truncf %30 : vector<8x896xf32> to vector<8x896xbf16>
    %c0_20 = arith.constant 0 : index
    %c0_21 = arith.constant 0 : index
    %32 = vector.load %arg9[%c0_20, %c0_21] : memref<896x256xbf16, #tpu.memory_space<vmem>>, vector<896x256xbf16>
    %cst_22 = arith.constant dense<0.000000e+00> : vector<8x256xf32>
    %33 = tpu.matmul %31, %32, %cst_22 {dimension_numbers = #tpu.dot_dimension_numbers<[1], [0], [0], [1], [0, 0, 1, 1], [], []>} : vector<8x896xbf16>, vector<896x256xbf16>, vector<8x256xf32> -> vector<8x256xf32>
    %c0_23 = arith.constant 0 : index
    %c0_24 = arith.constant 0 : index
    %34 = vector.load %arg10[%c0_23, %c0_24] : memref<1x256xf32, #tpu.memory_space<vmem>>, vector<1x256xf32>
    %35 = vector.broadcast %34 : vector<1x256xf32> to vector<8x256xf32>
    %36 = arith.addf %33, %35 : vector<8x256xf32>
    %37 = arith.negf %36 : vector<8x256xf32>
    %38 = math.exp %37 : vector<8x256xf32>
    %cst_25 = arith.constant 1.000000e+00 : f32
    %39 = vector.broadcast %cst_25 : f32 to vector<8x256xf32>
    %40 = arith.addf %39, %38 : vector<8x256xf32>
    %41 = arith.divf %39, %40 : vector<8x256xf32>
    %c0_26 = arith.constant 0 : index
    %c0_27 = arith.constant 0 : index
    %42 = vector.load %arg11[%c0_26, %c0_27] : memref<8x256xf32, #tpu.memory_space<vmem>>, vector<8x256xf32>
    tpu.vector_store %arg11[%c0_26, %c0_27], %41 {strides = array<i32>} : memref<8x256xf32, #tpu.memory_space<vmem>>, vector<8x256xf32>,
    %c0_28 = arith.constant 0 : index
    %c0_29 = arith.constant 0 : index
    %43 = vector.load %arg12[%c0_28, %c0_29] : memref<8x128xf32, #tpu.memory_space<vmem>>, vector<8x128xf32>
    tpu.vector_store %arg12[%c0_28, %c0_29], %15 {strides = array<i32>} : memref<8x128xf32, #tpu.memory_space<vmem>>, vector<8x128xf32>,
    return
  }
  func.func @transform_0(%arg0: i32) -> (i32, i32) {
    %c0_i32 = arith.constant 0 : i32
    %c0_i32_0 = arith.constant 0 : i32
    return %arg0, %c0_i32 : i32, i32
  }
  func.func @transform_1(%arg0: i32) -> (i32, i32) {
    %c0_i32 = arith.constant 0 : i32
    %c0_i32_0 = arith.constant 0 : i32
    return %arg0, %c0_i32 : i32, i32
  }
  func.func @transform_2(%arg0: i32) -> (i32, i32) {
    %c0_i32 = arith.constant 0 : i32
    %c0_i32_0 = arith.constant 0 : i32
    %c0_i32_1 = arith.constant 0 : i32
    return %c0_i32, %c0_i32_0 : i32, i32
  }
  func.func @transform_3(%arg0: i32) -> (i32, i32) {
    %c0_i32 = arith.constant 0 : i32
    %c0_i32_0 = arith.constant 0 : i32
    %c0_i32_1 = arith.constant 0 : i32
    return %c0_i32, %c0_i32_0 : i32, i32
  }
  func.func @transform_4(%arg0: i32) -> (i32, i32) {
    %c0_i32 = arith.constant 0 : i32
    %c0_i32_0 = arith.constant 0 : i32
    %c0_i32_1 = arith.constant 0 : i32
    return %c0_i32, %c0_i32_0 : i32, i32
  }
  func.func @transform_5(%arg0: i32) -> (i32, i32) {
    %c0_i32 = arith.constant 0 : i32
    %c0_i32_0 = arith.constant 0 : i32
    %c0_i32_1 = arith.constant 0 : i32
    return %c0_i32, %c0_i32_0 : i32, i32
  }
  func.func @transform_6(%arg0: i32) -> (i32, i32) {
    %c0_i32 = arith.constant 0 : i32
    %c0_i32_0 = arith.constant 0 : i32
    %c0_i32_1 = arith.constant 0 : i32
    return %c0_i32, %c0_i32_0 : i32, i32
  }
  func.func @transform_7(%arg0: i32) -> (i32, i32) {
    %c0_i32 = arith.constant 0 : i32
    %c0_i32_0 = arith.constant 0 : i32
    %c0_i32_1 = arith.constant 0 : i32
    return %c0_i32, %c0_i32_0 : i32, i32
  }
  func.func @transform_8(%arg0: i32) -> (i32, i32) {
    %c0_i32 = arith.constant 0 : i32
    %c0_i32_0 = arith.constant 0 : i32
    %c0_i32_1 = arith.constant 0 : i32
    return %c0_i32, %c0_i32_0 : i32, i32
  }
  func.func @transform_9(%arg0: i32) -> (i32, i32) {
    %c0_i32 = arith.constant 0 : i32
    %c0_i32_0 = arith.constant 0 : i32
    %c0_i32_1 = arith.constant 0 : i32
    return %c0_i32, %c0_i32_0 : i32, i32
  }
  func.func @transform_10(%arg0: i32) -> (i32, i32) {
    %c0_i32 = arith.constant 0 : i32
    %c0_i32_0 = arith.constant 0 : i32
    return %arg0, %c0_i32 : i32, i32
  }
  func.func @transform_11(%arg0: i32) -> (i32, i32) {
    %c0_i32 = arith.constant 0 : i32
    %c0_i32_0 = arith.constant 0 : i32
    return %arg0, %c0_i32 : i32, i32
  }
}

</mosaic_0001>

<bundles_post_ra>
// kernel: tpu_custom_call.1
= control target key start
LH: loop header
LB: loop body
LE: loop exit
PB: predicated region body
PF: predicated region fallthrough
CT: control target
= control target key end

     0   :  { %s5395_s0 = inlined_call_operand.hbm [shape: f32[16,256], index: 0, kind: input, shape index: {}]   ;;  %s5396_s1 = inlined_call_operand.hbm [shape: f32[16,64], index: 1, kind: input, shape index: {}]   ;;  %s5397_s2 = inlined_call_operand.hbm [shape: bf16[256,896], index: 2, kind: input, shape index: {}]   ;;  %s5398_s3 = inlined_call_operand.vmem [shape: f32[1,896], index: 3, kind: input, shape index: {}]   ;;  %s5399_s4 = inlined_call_operand.hbm [shape: bf16[896,128], index: 4, kind: input, shape index: {}]   ;;  %s5400_s5 = inlined_call_operand.vmem [shape: f32[1,128], index: 5, kind: input, shape index: {}]   ;;  %s5401_s6 = inlined_call_operand.hbm [shape: bf16[64,896], index: 6, kind: input, shape index: {}]   ;;  %s5402_s7 = inlined_call_operand.vmem [shape: f32[1,896], index: 7, kind: input, shape index: {}]   ;;  %s5403_s8 = inlined_call_operand.hbm [shape: bf16[896,256], index: 8, kind: input, shape index: {}]   ;;  %s5404_s9 = inlined_call_operand.vmem [shape: f32[1,256], index: 9, kind: input, shape index: {}]   ;;  %s5405_s10 = inlined_call_operand.hbm [shape: f32[16,256], index: 10, kind: output, shape index: {0}]   ;;  %s5406_s11 = inlined_call_operand.hbm [shape: f32[16,128], index: 11, kind: output, shape index: {1}]  }
   0x1   :  { %5414 = sst [smem:[#allocation23_spill]] %s5395_s0 }
   0x2   :  { %5415 = sst [smem:[#allocation24_spill]] %s5397_s2 }
   0x3   :  { %5416 = sst [smem:[#allocation25_spill]] %s5399_s4 }
   0x4   :  { %5417 = sst [smem:[#allocation26_spill]] %s5401_s6 }
   0x5   :  { %5418 = sst [smem:[#allocation27_spill]] %s5404_s9 }
   0x6   :  { %5419 = sst [smem:[#allocation28_spill]] %s5405_s10 }
   0x7   :  { %5420 = sst [smem:[#allocation29_spill]] %s5406_s11 }
   0x8   :  { %17 = vsyncpa [#allocation3], 0 }
   0x9   :  { %19 = vsyncpa [#allocation3 + $0x1], 0 }
   0xa   :  { %20 = vsyncpa [#allocation6], 0 }
   0xb   :  { %22 = vsyncpa [#allocation6 + $0x1], 0 }
   0xc   :  { %23 = vsyncpa [#allocation9], 0 }
   0xd   :  { %24 = vsyncpa [#allocation12], 0 }
   0xe   :  { %25 = vsyncpa [#allocation4], 0 }
   0xf   :  { %27 = vsyncpa [#allocation4 + $0x1], 0 }
  0x10   :  { %28 = vsyncpa [#allocation15], 0 }
  0x11   :  { %30 = vsyncpa [#allocation15 + $0x1], 0  ;;  %s4911_s17 = smov 0   ;;  %s4913_s18 = smov 0  }
  0x12   :  { %s4915_s19 = smov 0   ;;  %s4917_s20 = smov 0  }
  0x13 LB: > { %s4833_s21 = smov [#allocation7]   ;;  %s4932_s23 = sadd.s32 4294967295, %s4831_s20   ;;  %s4831_s20 = sphi %s4917_s20, %s5453_s20   ;;  %s4827_s19 = sphi %s4915_s19, %s5452_s19   ;;  %s4823_s18 = sphi %s4913_s18, %s5451_s18   ;;  %s4819_s17 = sphi %s4911_s17, %s5450_s17  }
  0x14   : > { %s325_s22 = sshll.u32 %s4833_s21, 4  ;;  %p3512_p0 = scmp.ge.s32.totalorder %s4831_s20, 1  ;;  %s4937_s22 = int_to_ptr.vmem [resolvable:$true] %s325_s22 }
  0x15   : > { %p5410_p1 = scmp.eq.s32.totalorder %s4932_s23, 0  ;;  %p313_p2 = scmp.lt.s32.totalorder %s4831_s20, 3 }
  0x16   : > { %s4834_s25 = smov [#allocation8]   ;;  %s4835_s28 = smov [#allocation10]  }
  0x17   : > { %p4939_p3 = pnand %p3512_p0, %p313_p2  ;;  %s341_s26 = sshll.u32 %s4834_s25, 4  ;;  %s4952_s26 = int_to_ptr.vmem [resolvable:$true] %s341_s26 }
  0x18   : > { %s4954_s29 = sshll.u32 %s4835_s28, 4  ;;  %s5423_s2 = sld [smem:[#allocation24_spill]]  ;;  %s358_s29 = int_to_ptr.vmem [resolvable:$true] %s4954_s29 }
  0x19   : > { %s5421_s24 = scalar_select %p4939_p3, 1, 0 }
  0x1a   : > { %p4028_p5 = pneg %p4939_p3 }
  0x1c   : > { %p4948_p6 = pnand %p4028_p5, %p5410_p1 }
  0x1e   : > { %s4545_s13 = scalar_lea.hbm %s5423_s2, 14336  ;;  %p4964_p8 = pneg %p4948_p6 }
  0x1f   : > { %p4546_p7 = scmp.ne.s32.totalorder %s5423_s2, %s4545_s13  ;;  %p4552_p11 = scmp.lt.u32.totalorder %s4545_s13, %s5423_s2 }
  0x21   : > { %p4548_p9 = pnand %p4964_p8, %p4546_p7 }
  0x23   : > { %p4549_p10 = pneg %p4548_p9 }
  0x25   : > { %p4554_p12 = pnand %p4552_p11, %p4549_p10 }
  0x27   : > { %4557 = shalt.err (!%p4554_p12)
}
  0x28   : > { %s4558_s28 = scalar_lea.vmem %s4937_s22, 14336  ;;  %p4566_p5 = scmp.lt.s32.totalorder %s4937_s22, %s4937_s22 }
  0x29   : > { %p4559_p13 = scmp.ne.s32.totalorder %s4937_s22, %s4558_s28  ;;  %p4567_p4 = scmp.lt.s32.totalorder %s4558_s28, %s4558_s28 }
  0x2b   : > { %p4561_p0 = pnand %p4559_p13, %p4964_p8  ;;  %p4568_p7 = por %p4567_p4, %p4566_p5 }
  0x2d   : > { %p4562_p2 = pneg %p4561_p0 }
  0x2f   : > { %p4569_p9 = pnand %p4568_p7, %p4562_p2 }
  0x31   : > { %4572 = shalt.err (!%p4569_p9)
}
  0x32   : > { %s5409_s30 = smov 448   ;;  %s4837_s12 = smov 28  }
  0x33   : > { %4031 = dma.hbm_to_vmem [thread:$0]  (!%p4948_p6), %s5423_s2, 14336, %s4937_s22, [#allocation6], %s5409_s30, %s5409_s30, %s4837_s12  }
  0x34   : > { %s5425_s4 = sld [smem:[#allocation25_spill]] }
  0x3a   : > { %s4573_s25 = scalar_lea.hbm %s5425_s4, 7168 }
  0x3b   : > { %p4574_p4 = scmp.ne.s32.totalorder %s5425_s4, %s4573_s25  ;;  %p4580_p12 = scmp.lt.u32.totalorder %s4573_s25, %s5425_s4 }
  0x3d   : > { %p4576_p10 = pnand %p4574_p4, %p4964_p8 }
  0x3f   : > { %p4577_p11 = pneg %p4576_p10 }
  0x41   : > { %p4582_p13 = pnand %p4580_p12, %p4577_p11 }
  0x43   : > { %4585 = shalt.err (!%p4582_p13)
}
  0x44   : > { %s4586_s22 = scalar_lea.vmem %s4952_s26, 7168  ;;  %p4594_p7 = scmp.lt.s32.totalorder %s4952_s26, %s4952_s26 }
  0x45   : > { %p4587_p0 = scmp.ne.s32.totalorder %s4952_s26, %s4586_s22  ;;  %p4595_p9 = scmp.lt.s32.totalorder %s4586_s22, %s4586_s22 }
  0x47   : > { %p4589_p2 = pnand %p4587_p0, %p4964_p8  ;;  %p4596_p4 = por %p4595_p9, %p4594_p7 }
  0x49   : > { %p4590_p5 = pneg %p4589_p2 }
  0x4b   : > { %p4597_p10 = pnand %p4596_p4, %p4590_p5 }
  0x4d   : > { %4600 = shalt.err (!%p4597_p10)
}
  0x4e   : > { %s4838_s10 = smov 64   ;;  %s4839_s9 = smov 4  }
  0x4f   : > { %4034 = dma.hbm_to_vmem [thread:$0]  (!%p4948_p6), %s5425_s4, 7168, %s4952_s26, [#allocation9], %s4838_s10, %s4838_s10, %s4839_s9  }
  0x50   : > { %s5426_s6 = sld [smem:[#allocation26_spill]] }
  0x56   : > { %s4601_s21 = scalar_lea.hbm %s5426_s6, 3584 }
  0x57   : > { %p4602_p11 = scmp.ne.s32.totalorder %s5426_s6, %s4601_s21  ;;  %p4608_p0 = scmp.lt.u32.totalorder %s4601_s21, %s5426_s6 }
  0x59   : > { %p4604_p12 = pnand %p4602_p11, %p4964_p8 }
  0x5b   : > { %p4605_p13 = pneg %p4604_p12 }
  0x5d   : > { %p4610_p2 = pnand %p4608_p0, %p4605_p13 }
  0x5f   : > { %4613 = shalt.err (!%p4610_p2)
}
  0x60   : > { %s4614_s11 = scalar_lea.vmem %s358_s29, 3584  ;;  %p4622_p4 = scmp.lt.s32.totalorder %s358_s29, %s358_s29 }
  0x61   : > { %p4615_p5 = scmp.ne.s32.totalorder %s358_s29, %s4614_s11  ;;  %p4623_p10 = scmp.lt.s32.totalorder %s4614_s11, %s4614_s11 }
  0x63   : > { %p4617_p7 = pnand %p4615_p5, %p4964_p8  ;;  %p4624_p1 = por %p4623_p10, %p4622_p4 }
  0x65   : > { %p4618_p9 = pneg %p4617_p7 }
  0x67   : > { %p4625_p3 = pnand %p4624_p1, %p4618_p9 }
  0x69   : > { %4628 = shalt.err (!%p4625_p3)
}
  0x6a   : > { %s5427_s26 = smov 448   ;;  %s4840_s9 = smov [#allocation11]  }
  0x6b   : > { %4037 = dma.hbm_to_vmem [thread:$0]  (!%p4948_p6), %s5426_s6, 3584, %s358_s29, [#allocation9], %s5427_s26, %s5427_s26, %s4837_s12  }
  0x6c   : > { %s373_s13 = sshll.u32 %s4840_s9, 4  ;;  %s4629_s21 = scalar_lea.hbm %s5403_s8, 14336  ;;  %s374_s13 = int_to_ptr.vmem [resolvable:$true] %s373_s13 }
  0x6d   : > { %p4630_p1 = scmp.ne.s32.totalorder %s5403_s8, %s4629_s21  ;;  %p4636_p12 = scmp.lt.u32.totalorder %s4629_s21, %s5403_s8 }
  0x6f   : > { %p4632_p3 = pnand %p4630_p1, %p4964_p8 }
  0x71   : > { %p4633_p11 = pneg %p4632_p3 }
  0x73   : > { %p4638_p13 = pnand %p4636_p12, %p4633_p11 }
  0x75   : > { %4641 = shalt.err (!%p4638_p13)
}
  0x76   : > { %s4642_s29 = scalar_lea.vmem %s374_s13, 14336  ;;  %p4650_p7 = scmp.lt.s32.totalorder %s374_s13, %s374_s13 }
  0x77   : > { %p4643_p0 = scmp.ne.s32.totalorder %s374_s13, %s4642_s29  ;;  %p4651_p9 = scmp.lt.s32.totalorder %s4642_s29, %s4642_s29 }
  0x79   : > { %p4645_p2 = pnand %p4643_p0, %p4964_p8  ;;  %p4652_p4 = por %p4651_p9, %p4650_p7 }
  0x7b   : > { %p4646_p5 = pneg %p4645_p2 }
  0x7d   : > { %p4653_p10 = pnand %p4652_p4, %p4646_p5 }
  0x7f   : > { %4656 = shalt.err (!%p4653_p10)
}
  0x80   : > { %s4841_s12 = smov 128   ;;  %s4842_s16 = smov 8  }
  0x81   : > { %4040 = dma.hbm_to_vmem [thread:$0]  (!%p4948_p6), %s5403_s8, 14336, %s374_s13, [#allocation12], %s4841_s12, %s4841_s12, %s4842_s16  }
  0x82   : > { %s3511_s10 = sadd.s32 4294967294, %s4831_s20   ;;  %s5053_s9 = sadd.s32 1, %s4831_s20  }
  0x83   : > { %s40_s14 = ssub.s32 %s4831_s20, %s5053_s9  ;;  %s43_s15 = sadd.s32 1, %s4827_s19 }
  0x84   : > { %p41_p8 = scmp.eq.s32.totalorder %s40_s14, 0  ;;  %p50_p1 = scmp.ne.s32.totalorder %s4827_s19, %s4823_s18 }
  0x85   : > { %p51_p3 = scmp.eq.s32.totalorder %s4831_s20, 0  ;;  %p56_p11 = scmp.ne.s32.totalorder %s4823_s18, %s4819_s17 }
  0x86   : > { %s5064_s21 = scalar_select %p41_p8, %s4827_s19, %s43_s15  }
  0x87   : > { %p5066_p12 = por %p51_p3, %p50_p1  ;;  %p5429_p13 = scmp.eq.s32.totalorder %s4932_s23, 0 }
  0x88   : > { %p274_p0 = scmp.eq.s32.totalorder %s4932_s23, 1  ;;  %p280_p2 = scmp.eq.s32.totalorder %s3511_s10, 1 }
  0x89   : > { %p5072_p6 = por %p5429_p13, %p56_p11  ;;  %p4059_p5 = scmp.lt.s32.totalorder %s4831_s20, 2 }
  0x8a   : > { %s5079_s25 = sand.u32 1, %s4827_s19   ;;  %p5081_p7 = por %p274_p0, %p50_p1 }
  0x8b   : > { %s5430_s13 = scalar_select %p5072_p6, 1, 0 }
  0x8c   : > { %s5431_s28 = scalar_select %p5081_p7, 1, 0 }
  0x8d   : > { %p5085_p9 = por %p280_p2, %p56_p11  ;;  %s3518_s11 = sshll.u32 %s5079_s25, 4 }
  0x8e   : > { %s3854_s29 = sshll.u32 %s4831_s20, 8  ;;  %s5433_s0 = sld [smem:[#allocation23_spill]] }
  0x8f   : > { %s5432_s22 = scalar_select %p5085_p9, 1, 0 }
  0x90   : > { %s394_s30 = scalar_lea.vmem [#allocation2], %s3518_s11  ;;  %p5100_p4 = pnand %p4059_p5, %p5066_p12 }
  0x91   : > { %s402_s10 = sshll.u32 %s394_s30, 4  ;;  %s3521_s2 = sshll.u32 %s5079_s25, 3  ;;  %s5096_s10 = int_to_ptr.vmem [resolvable:$true] %s402_s10 }
  0x92   : > { %s391_s12 = scalar_lea.sflag [#allocation3], %s5079_s25  ;;  %p4659_p8 = pneg %p5100_p4 }
  0x94   : > { %s5094_s26 = scalar_lea.hbm %s5433_s0, %s3854_s29  ;;  %s4662_s27 = scalar_lea.hbm %s5433_s0, 512 }
  0x95   : > { %s4657_s29 = scalar_lea.hbm %s5094_s26, 256  ;;  %p4663_p11 = scmp.lt.u32.totalorder %s5094_s26, %s5433_s0 }
  0x96   : > { %p4658_p10 = scmp.ne.s32.totalorder %s5094_s26, %s4657_s29  ;;  %p4664_p12 = scmp.lt.u32.totalorder %s4662_s27, %s4657_s29 }
  0x97   : > { %p4666_p0 = scmp.lt.u32.totalorder %s4657_s29, %s5094_s26 }
  0x98   : > { %p4660_p1 = pnand %p4659_p8, %p4658_p10  ;;  %p4665_p13 = por %p4664_p12, %p4663_p11 }
  0x9a   : > { %p4661_p3 = pneg %p4660_p1  ;;  %p4667_p2 = por %p4666_p0, %p4665_p13 }
  0x9c   : > { %p4668_p5 = pnand %p4667_p2, %p4661_p3 }
  0x9e   : > { %4671 = shalt.err (!%p4668_p5)
}
  0x9f   : > { %s4672_s15 = scalar_lea.vmem %s5096_s10, 256  ;;  %s4843_s11 = smov [#allocation2]  }
  0xa0   : > { %p4673_p10 = scmp.ne.s32.totalorder %s5096_s10, %s4672_s15  ;;  %s4677_s16 = sshll.u32 %s4843_s11, 4  ;;  %s4678_s16 = int_to_ptr.vmem [resolvable:$false] %s4677_s16 }
  0xa1   : > { %s4679_s4 = scalar_lea.vmem %s4678_s16, 512  ;;  %p4680_p7 = scmp.lt.s32.totalorder %s5096_s10, %s4678_s16 }
  0xa2   : > { %p4675_p1 = pnand %p4673_p10, %p4659_p8  ;;  %p4681_p11 = scmp.lt.s32.totalorder %s4679_s4, %s4672_s15 }
  0xa4   : > { %p4676_p9 = pneg %p4675_p1  ;;  %p4682_p12 = por %p4681_p11, %p4680_p7 }
  0xa6   : > { %p4683_p13 = pnand %p4682_p12, %p4676_p9 }
  0xa8   : > { %4686 = shalt.err (!%p4683_p13)
}
  0xa9   : > { %4044 = dma.hbm_to_vmem [thread:$0]  (!%p5100_p4), %s5094_s26, 256, %s5096_s10, %s391_s12  }
  0xaa   : > { %s3522_s29 = sshll.u32 %s4831_s20, 7  ;;  %s413_s15 = scalar_lea.vmem [#allocation5], %s3521_s2 }
  0xab   : > { %s5136_s11 = scalar_lea.hbm %s5396_s1, %s3522_s29  ;;  %s420_s16 = sshll.u32 %s413_s15, 4  ;;  %s421_s16 = int_to_ptr.vmem [resolvable:$true] %s420_s16 }
  0xac   : > { %s5435_s4 = sand.u32 1, %s4831_s20   ;;  %s4687_s6 = scalar_lea.hbm %s5136_s11, 128 }
  0xad   : > { %s410_s0 = scalar_lea.sflag [#allocation6], %s5435_s4  ;;  %p4688_p7 = scmp.ne.s32.totalorder %s5136_s11, %s4687_s6 }
  0xae   : > { %s4692_s12 = scalar_lea.hbm %s5396_s1, 256  ;;  %p4693_p0 = scmp.lt.u32.totalorder %s5136_s11, %s5396_s1 }
  0xaf   : > { %p4690_p9 = pnand %p4688_p7, %p4659_p8  ;;  %p4694_p2 = scmp.lt.u32.totalorder %s4692_s12, %s4687_s6 }
  0xb0   : > { %p4696_p10 = scmp.lt.u32.totalorder %s4687_s6, %s5136_s11 }
  0xb1   : > { %p4691_p3 = pneg %p4690_p9  ;;  %p4695_p5 = por %p4694_p2, %p4693_p0 }
  0xb3   : > { %p4697_p1 = por %p4696_p10, %p4695_p5 }
  0xb5   : > { %p4698_p11 = pnand %p4697_p1, %p4691_p3 }
  0xb7   : > { %4701 = shalt.err (!%p4698_p11)
}
  0xb8   : > { %s4702_s2 = scalar_lea.vmem %s421_s16, 128  ;;  %s4844_s27 = smov [#allocation5]  }
  0xb9   : > { %p4703_p12 = scmp.ne.s32.totalorder %s421_s16, %s4702_s2  ;;  %s4707_s30 = sshll.u32 %s4844_s27, 4  ;;  %s4708_s30 = int_to_ptr.vmem [resolvable:$false] %s4707_s30 }
  0xba   : > { %s4709_s15 = scalar_lea.vmem %s4708_s30, 256  ;;  %p4710_p9 = scmp.lt.s32.totalorder %s421_s16, %s4708_s30 }
  0xbb   : > { %p4705_p13 = pnand %p4703_p12, %p4659_p8  ;;  %p4711_p6 = scmp.lt.s32.totalorder %s4709_s15, %s4702_s2 }
  0xbd   : > { %p4706_p7 = pneg %p4705_p13  ;;  %p4712_p0 = por %p4711_p6, %p4710_p9 }
  0xbf   : > { %p4713_p2 = pnand %p4712_p0, %p4706_p7 }
  0xc1   : > { %4716 = shalt.err (!%p4713_p2)
}
  0xc2   : > { %4047 = dma.hbm_to_vmem [thread:$0]  (!%p5100_p4), %s5136_s11, 128, %s421_s16, %s410_s0  }
  0xc3   : > { %p5436_p3 = scmp.ne.s32.totalorder %s5421_s24, 0 }
  0xc4   : > { %s5164_s6 = sand.u32 (!%p5436_p3), 1, %s4823_s18   ;;  %p5437_p6 = scmp.ne.s32.totalorder (!%p5436_p3), %s5430_s13, 0 }
  0xc5   : > { %429 = sbr.rel (%p5436_p3) target bundleno = 1648 (0x670), region = 60  ;;  %s3524_s4 = sshll.u32 (!%p5436_p3), %s5164_s6, 4 }
  0xc6   : > { %s432_s26 = scalar_lea.sflag (!%p5436_p3), [#allocation3], %s5164_s6  ;;  %s5170_s10 = scalar_lea.vmem (!%p5436_p3), [#allocation2], %s3524_s4 }
  0xcc   : > { %4790 = dma.done.wait (%p5437_p6), %s432_s26, 256  }
  0xcd   : > { %4792 = vsyncadd (%p5437_p6), %s432_s26, 4294967040  ;;  %s440_s0 = sand.u32 1, %s4932_s23   ;;  %s3525_s24 = sshll.u32 %s5164_s6, 3 }
  0xce   : > { %s441_s14 = scalar_lea.sflag [#allocation6], %s440_s0  ;;  %s5180_s11 = scalar_lea.vmem [#allocation5], %s3525_s24 }
  0xcf   : > { %4794 = dma.done.wait (%p5437_p6), %s441_s14, 128  }
  0xd0   : > { %4796 = vsyncadd (%p5437_p6), %s441_s14, 4294967168  ;;  %p5438_p4 = scmp.eq.s32.totalorder %s4932_s23, 0 }
  0xd2   : > { %4798 = dma.done.wait (%p5438_p4), [#allocation6], 14336   ;;  %p5439_p8 = pmov %p5438_p4 }
  0xd3   : > { %p5440_p5 = pmov %p5438_p4 }
  0xd4   : > { %4800 = vsyncadd (%p5439_p8), [#allocation6], 4294952960 }
  0xd5   : > { %4802 = dma.done.wait (%p5440_p5), [#allocation9], 10752   ;;  %p5441_p10 = pmov %p5438_p4 }
  0xd6   : > { %p5442_p1 = pmov %p5438_p4 }
  0xd7   : > { %4804 = vsyncadd (%p5441_p10), [#allocation9], 4294956544 }
  0xd8   : > { %4806 = dma.done.wait (%p5442_p1), [#allocation12], 14336   ;;  %p5443_p11 = pmov %p5442_p1 }
  0xd9   : > { %v4111_v0 = vld [vmem:[#allocation7 + $0x4] ss:$28 sps:$4 sm:$0xff]   ;;  %v4114_v2 = vld [vmem:[#allocation7 + $0x3c] ss:$28 sps:$4 sm:$0xff]   ;;  %v4117_v4 = vld [vmem:[#allocation7 + $0x74] ss:$28 sps:$4 sm:$0xff]  }
  0xda   : > { %4808 = vsyncadd (%p5443_p11), [#allocation12], 4294952960  ;;  %v4113_v1 = vld [vmem:[#allocation7] ss:$28 sps:$4 sm:$0xff]   ;;  %1256 = vmatprep.subr.bf16.mxu1 %v4111_v0  ;;  %v4116_v3 = vld [vmem:[#allocation7 + $0x38] ss:$28 sps:$4 sm:$0xff]  }
  0xdb   : > { %1257 = vmatpush1.bf16.msra.mxu1 %v4113_v1  ;;  %v4119_v5 = vld [vmem:[#allocation7 + $0x70] ss:$28 sps:$4 sm:$0xff]   ;;  %v4122_v7 = vld [vmem:[#allocation7 + $0xa8] ss:$28 sps:$4 sm:$0xff]   ;;  %v4125_v9 = vld [vmem:[#allocation7 + $0xe0] ss:$28 sps:$4 sm:$0xff]  }
  0xdc   : > { %1258 = vmatprep.subr.bf16.mxu1 %v4114_v2  ;;  %v4120_v6 = vld [vmem:[#allocation7 + $0xac] ss:$28 sps:$4 sm:$0xff]   ;;  %v4123_v8 = vld [vmem:[#allocation7 + $0xe4] ss:$28 sps:$4 sm:$0xff]   ;;  %v4126_v10 = vld [vmem:[#allocation7 + $0x11c] ss:$28 sps:$4 sm:$0xff]  }
  0xdd   : > { %v4128_v11 = vld [vmem:[#allocation7 + $0x118] ss:$28 sps:$4 sm:$0xff]   ;;  %v4131_v15 = vld [vmem:[#allocation7 + $0x150] ss:$28 sps:$4 sm:$0xff]   ;;  %v4134_v17 = vld [vmem:[#allocation7 + $0x188] ss:$28 sps:$4 sm:$0xff]  }
  0xde   : > { %v4129_v12 = vld [vmem:[#allocation7 + $0x154] ss:$28 sps:$4 sm:$0xff]   ;;  %v511_v13 = vld [vmem:[%s5170_s10 + $0x8] sm:$0xff]  ;;  %v4135_v18 = vld [vmem:[#allocation7 + $0x1c4] ss:$28 sps:$4 sm:$0xff]   ;;  %vm4846_vm0 = vmmov 0  }
  0xdf   : > { %1259 = vmatpush1.bf16.msra.mxu1 %v4116_v3  ;;  %v5199_v14 = vpack.c.bf16 %v511_v13, %v511_v13  ;;  %v4132_v16 = vld [vmem:[#allocation7 + $0x18c] ss:$28 sps:$4 sm:$0xff]   ;;  %v4137_v19 = vld [vmem:[#allocation7 + $0x1c0] ss:$28 sps:$4 sm:$0xff]   ;;  %v4140_v21 = vld [vmem:[#allocation7 + $0x1f8] ss:$28 sps:$4 sm:$0xff]  }
  0xe0   : > { %1260 = vmatprep.subr.bf16.mxu1 %v4117_v4  ;;  %v4138_v20 = vld [vmem:[#allocation7 + $0x1fc] ss:$28 sps:$4 sm:$0xff]   ;;  %v4141_v22 = vld [vmem:[#allocation7 + $0x234] ss:$28 sps:$4 sm:$0xff]   ;;  %v4144_v24 = vld [vmem:[#allocation7 + $0x26c] ss:$28 sps:$4 sm:$0xff]  }
  0xe1   : > { %1288 = vmatprep.mubr.bf16.mxu1 %v5199_v14  ;;  %v4143_v23 = vld [vmem:[#allocation7 + $0x230] ss:$28 sps:$4 sm:$0xff]   ;;  %v4146_v25 = vld [vmem:[#allocation7 + $0x268] ss:$28 sps:$4 sm:$0xff]   ;;  %v4149_v27 = vld [vmem:[#allocation7 + $0x2a0] ss:$28 sps:$4 sm:$0xff]  }
  0xe2   : > { %v4147_v26 = vld [vmem:[#allocation7 + $0x2a4] ss:$28 sps:$4 sm:$0xff]   ;;  %v4150_v28 = vld [vmem:[#allocation7 + $0x2dc] ss:$28 sps:$4 sm:$0xff]   ;;  %v4153_v30 = vld [vmem:[#allocation7 + $0x314] ss:$28 sps:$4 sm:$0xff]  }
  0xe3   : > { %1261 = vmatpush1.bf16.msra.mxu1 %v4119_v5  ;;  %v4152_v29 = vld [vmem:[#allocation7 + $0x2d8] ss:$28 sps:$4 sm:$0xff]   ;;  %v4155_v31 = vld [vmem:[#allocation7 + $0x310] ss:$28 sps:$4 sm:$0xff]   ;;  %v4158_v33 = vld [vmem:[#allocation7 + $0x348] ss:$28 sps:$4 sm:$0xff]  }
  0xe4   : > { %1262 = vmatprep.subr.bf16.mxu1 %v4120_v6  ;;  %v4156_v32 = vld [vmem:[#allocation7 + $0x34c] ss:$28 sps:$4 sm:$0xff]   ;;  %v510_v34 = vld [vmem:[%s5170_s10] sm:$0xff]  ;;  %v4167_v40 = vld [vmem:[#allocation7 + $0x7c] ss:$28 sps:$4 sm:$0xff]   ;;  %s5264_s29 = scalar_lea.vmem [#allocation14], %s3525_s24 }
  0xe5   : > { %v4161_v35 = vld [vmem:[#allocation7 + $0xc] ss:$28 sps:$4 sm:$0xff]   ;;  %v5203_v36 = vpack.c.bf16 %v510_v34, %v510_v34  ;;  %v4164_v38 = vld [vmem:[#allocation7 + $0x44] ss:$28 sps:$4 sm:$0xff]   ;;  %v4165_v41 = vld [vmem:[#allocation7 + $0x78] ss:$28 sps:$4 sm:$0xff]  }
  0xe6   : > { %v4159_v37 = vld [vmem:[#allocation7 + $0x8] ss:$28 sps:$4 sm:$0xff]   ;;  %v4162_v39 = vld [vmem:[#allocation7 + $0x40] ss:$28 sps:$4 sm:$0xff]   ;;  %v4170_v42 = vld [vmem:[#allocation7 + $0xb4] ss:$28 sps:$4 sm:$0xff]  }
  0xe7   : > { %1263 = vmatpush1.bf16.msra.mxu1 %v4122_v7  ;;  %v4168_v43 = vld [vmem:[#allocation7 + $0xb0] ss:$28 sps:$4 sm:$0xff]   ;;  %v4171_v45 = vld [vmem:[#allocation7 + $0xe8] ss:$28 sps:$4 sm:$0xff]   ;;  %v4174_v47 = vld [vmem:[#allocation7 + $0x120] ss:$28 sps:$4 sm:$0xff]  }
  0xe8   : > { %1264 = vmatprep.subr.bf16.mxu1 %v4123_v8  ;;  %v4173_v44 = vld [vmem:[#allocation7 + $0xec] ss:$28 sps:$4 sm:$0xff]   ;;  %v4176_v46 = vld [vmem:[#allocation7 + $0x124] ss:$28 sps:$4 sm:$0xff]   ;;  %v4179_v48 = vld [vmem:[#allocation7 + $0x15c] ss:$28 sps:$4 sm:$0xff]  }
  0xe9   : > { %v4177_v49 = vld [vmem:[#allocation7 + $0x158] ss:$28 sps:$4 sm:$0xff]   ;;  %v4180_v51 = vld [vmem:[#allocation7 + $0x190] ss:$28 sps:$4 sm:$0xff]   ;;  %v4183_v53 = vld [vmem:[#allocation7 + $0x1c8] ss:$28 sps:$4 sm:$0xff]  }
  0xea   : > { %v4182_v50 = vld [vmem:[#allocation7 + $0x194] ss:$28 sps:$4 sm:$0xff]   ;;  %v4185_v52 = vld [vmem:[#allocation7 + $0x1cc] ss:$28 sps:$4 sm:$0xff]   ;;  %v4188_v54 = vld [vmem:[#allocation7 + $0x204] ss:$28 sps:$4 sm:$0xff]  }
  0xeb   : > { %1265 = vmatpush1.bf16.msra.mxu1 %v4125_v9  ;;  %v4186_v55 = vld [vmem:[#allocation7 + $0x200] ss:$28 sps:$4 sm:$0xff]   ;;  %v4189_v57 = vld [vmem:[#allocation7 + $0x238] ss:$28 sps:$4 sm:$0xff]   ;;  %v4192_v59 = vld [vmem:[#allocation7 + $0x270] ss:$28 sps:$4 sm:$0xff]  }
  0xec   : > { %1266 = vmatprep.subr.bf16.mxu1 %v4126_v10  ;;  %v4191_v56 = vld [vmem:[#allocation7 + $0x23c] ss:$28 sps:$4 sm:$0xff]   ;;  %v4194_v58 = vld [vmem:[#allocation7 + $0x274] ss:$28 sps:$4 sm:$0xff]   ;;  %v4197_v60 = vld [vmem:[#allocation7 + $0x2ac] ss:$28 sps:$4 sm:$0xff]  }
  0xed   : > { %v4195_v61 = vld [vmem:[#allocation7 + $0x2a8] ss:$28 sps:$4 sm:$0xff]   ;;  %v4198_v63 = vld [vmem:[#allocation7 + $0x2e0] ss:$28 sps:$4 sm:$0xff]   ;;  %v4201_v1 = vld [vmem:[#allocation7 + $0x318] ss:$28 sps:$4 sm:$0xff]  }
  0xee   : > { %v4200_v62 = vld [vmem:[#allocation7 + $0x2e4] ss:$28 sps:$4 sm:$0xff]   ;;  %v4203_v0 = vld [vmem:[#allocation7 + $0x31c] ss:$28 sps:$4 sm:$0xff]   ;;  %v4206_v2 = vld [vmem:[#allocation7 + $0x354] ss:$28 sps:$4 sm:$0xff]  }
  0xef   : > { %1267 = vmatpush1.bf16.msra.mxu1 %v4128_v11  ;;  %v4204_v3 = vld [vmem:[#allocation7 + $0x350] ss:$28 sps:$4 sm:$0xff]   ;;  %v4210_v7 = vld [vmem:[#allocation7 + $0x48] ss:$28 sps:$4 sm:$0xff]   ;;  %v4213_v9 = vld [vmem:[#allocation7 + $0x80] ss:$28 sps:$4 sm:$0xff]  }
  0xf0   : > { %1268 = vmatprep.subr.bf16.mxu1 %v4129_v12  ;;  %v4209_v4 = vld [vmem:[#allocation7 + $0x14] ss:$28 sps:$4 sm:$0xff]   ;;  %v4212_v6 = vld [vmem:[#allocation7 + $0x4c] ss:$28 sps:$4 sm:$0xff]   ;;  %v4215_v8 = vld [vmem:[#allocation7 + $0x84] ss:$28 sps:$4 sm:$0xff]  }
  0xf1   : > { %v4207_v5 = vld [vmem:[#allocation7 + $0x10] ss:$28 sps:$4 sm:$0xff]   ;;  %v4218_v10 = vld [vmem:[#allocation7 + $0xbc] ss:$28 sps:$4 sm:$0xff]   ;;  %s4848_s2 = smov 64   ;;  %vm2271_vm1 = vcmask 523264  }
  0xf2   : > { %v4216_v11 = vld [vmem:[#allocation7 + $0xb8] ss:$28 sps:$4 sm:$0xff]   ;;  %v4219_v13 = vld [vmem:[#allocation7 + $0xf0] ss:$28 sps:$4 sm:$0xff]   ;;  %s3851_s15 = sshll.u32 %s4932_s23, 7  ;;  %s3348_s26 = sshll.u32 %s5264_s29, 4  ;;  %s3349_s26 = int_to_ptr.vmem [resolvable:$true] %s3348_s26 }
  0xf3   : > { %1269 = vmatpush1.bf16.msra.mxu1 %v4131_v15  ;;  %v4221_v12 = vld [vmem:[#allocation7 + $0xf4] ss:$28 sps:$4 sm:$0xff]   ;;  %v4224_v15 = vld [vmem:[#allocation7 + $0x12c] ss:$28 sps:$4 sm:$0xff]   ;;  %v4242_v34 = vld [vmem:[#allocation7 + $0x27c] ss:$28 sps:$4 sm:$0xff]  }
  0xf4   : > { %1270 = vmatprep.subr.bf16.mxu1 %v4132_v16  ;;  %v4222_v16 = vld [vmem:[#allocation7 + $0x128] ss:$28 sps:$4 sm:$0xff]   ;;  %s5444_s24 = sld [smem:[#allocation29_spill]]  ;;  %s4717_s13 = scalar_lea.vmem %s3349_s26, 128 }
  0xf5   : > { %p4718_p12 = scmp.ne.s32.totalorder %s3349_s26, %s4717_s13  ;;  %p5445_p13 = scmp.ne.s32.totalorder %s5431_s28, 0 }
  0xf6   : > { %s4849_s16 = smov [#allocation14]  }
  0xf7   : > { %1271 = vmatpush1.bf16.msra.mxu1 %v4134_v17  ;;  %v4227_v17 = vld [vmem:[#allocation7 + $0x164] ss:$28 sps:$4 sm:$0xff]   ;;  %p4719_p7 = pnand %p4718_p12, %p5445_p13  ;;  %s4721_s12 = sshll.u32 %s4849_s16, 4  ;;  %s4722_s12 = int_to_ptr.vmem [resolvable:$false] %s4721_s12 }
  0xf8   : > { %1272 = vmatprep.subr.bf16.mxu1 %v4135_v18  ;;  %v4225_v18 = vld [vmem:[#allocation7 + $0x160] ss:$28 sps:$4 sm:$0xff]   ;;  %s4723_s25 = scalar_lea.vmem %s4722_s12, 256  ;;  %p4724_p0 = scmp.lt.s32.totalorder %s3349_s26, %s4722_s12 }
  0xf9   : > { %p4720_p9 = pneg %p4719_p7  ;;  %p4725_p2 = scmp.lt.s32.totalorder %s4723_s25, %s4717_s13 }
  0xfa   : > { %s5320_s14 = scalar_lea.hbm %s5444_s24, %s3851_s15 }
  0xfb   : > { %1273 = vmatpush1.bf16.msra.mxu1 %v4137_v19  ;;  %v4230_v19 = vld [vmem:[#allocation7 + $0x19c] ss:$28 sps:$4 sm:$0xff]   ;;  %p4726_p3 = por %p4725_p2, %p4724_p0 }
  0xfc   : > { %1274 = vmatprep.subr.bf16.mxu1 %v4138_v20  ;;  %v4228_v20 = vld [vmem:[#allocation7 + $0x198] ss:$28 sps:$4 sm:$0xff]  }
  0xfd   : > { %p4727_p6 = pnand %p4726_p3, %p4720_p9 }
  0xff   : > { %1275 = vmatpush1.bf16.msra.mxu1 %v4140_v21  ;;  %v4233_v21 = vld [vmem:[#allocation7 + $0x1d4] ss:$28 sps:$4 sm:$0xff]  }
 0x100   : > { %1276 = vmatprep.subr.bf16.mxu1 %v4141_v22  ;;  %v4287_v22 = vld [vmem:[#allocation8 + $0xc0] sm:$0xff]  }
 0x101   : > { %3900 = vmatprep.subr.bf16.mxu0 %v4287_v22  ;;  %v645_v22 = vlaneseq }
 0x103   : > { %1277 = vmatpush1.bf16.msra.mxu1 %v4143_v23  ;;  %v4288_v23 = vld [vmem:[#allocation8 + $0x80] sm:$0xff]  }
 0x104   : > { %1278 = vmatprep.subr.bf16.mxu1 %v4144_v24  ;;  %v4289_v24 = vld [vmem:[#allocation8 + $0xc8] sm:$0xff]   ;;  %3901 = vmatpush3.bf16.msra.mxu0 %v4288_v23  ;;  %v5212_v23 = vshrl.u32 %v645_v22, 7 }
 0x105   : > { %3902 = vmatprep.subr.bf16.mxu0 %v4289_v24 }
 0x106   : > { %v5215_v24 = vsub.s32 0, %v5212_v23 }
 0x107   : > { %1279 = vmatpush1.bf16.msra.mxu1 %v4146_v25  ;;  %v4231_v25 = vld [vmem:[#allocation7 + $0x1d0] ss:$28 sps:$4 sm:$0xff]  }
 0x108   : > { %1280 = vmatprep.subr.bf16.mxu1 %v4147_v26  ;;  %v4236_v26 = vld [vmem:[#allocation7 + $0x20c] ss:$28 sps:$4 sm:$0xff]  }
 0x10b   : > { %1281 = vmatpush1.bf16.msra.mxu1 %v4149_v27  ;;  %v4234_v27 = vld [vmem:[#allocation7 + $0x208] ss:$28 sps:$4 sm:$0xff]  }
 0x10c   : > { %1282 = vmatprep.subr.bf16.mxu1 %v4150_v28  ;;  %v4290_v28 = vld [vmem:[#allocation8 + $0x88] sm:$0xff]  }
 0x10d   : > { %3903 = vmatpush3.bf16.msra.mxu0 %v4290_v28 }
 0x10f   : > { %1283 = vmatpush1.bf16.msra.mxu1 %v4152_v29  ;;  %v4291_v29 = vld [vmem:[#allocation8 + $0xd0] sm:$0xff]  }
 0x110   : > { %1284 = vmatprep.subr.bf16.mxu1 %v4153_v30  ;;  %v4239_v30 = vld [vmem:[#allocation7 + $0x244] ss:$28 sps:$4 sm:$0xff]   ;;  %3904 = vmatprep.subr.bf16.mxu0 %v4291_v29 }
 0x113   : > { %1285 = vmatpush1.bf16.msra.mxu1 %v4155_v31  ;;  %v4292_v31 = vld [vmem:[#allocation8 + $0x90] sm:$0xff]  }
 0x114   : > { %1286 = vmatprep.subr.bf16.mxu1 %v4156_v32  ;;  %v4293_v32 = vld [vmem:[#allocation8 + $0xd8] sm:$0xff]   ;;  %3905 = vmatpush3.bf16.msra.mxu0 %v4292_v31 }
 0x115   : > { %3906 = vmatprep.subr.bf16.mxu0 %v4293_v32 }
 0x117   : > { %1287 = vmatpush1.bf16.msra.mxu1 %v4158_v33  ;;  %v4237_v33 = vld [vmem:[#allocation7 + $0x240] ss:$28 sps:$4 sm:$0xff]  }
 0x118   : > { %1297 = vmatprep.subr.bf16.mxu1 %v4161_v35  ;;  %v4294_v35 = vld [vmem:[#allocation8 + $0x98] sm:$0xff]  }
 0x119   : > { %3907 = vmatpush3.bf16.msra.mxu0 %v4294_v35 }
 0x11a   : > { %1289 = vmatmul.mubr.bf16.vlgmr.msra.gmra.mrb[0].mxu1 %v5203_v36 }
 0x11b   : > { %1298 = vmatpush1.bf16.msra.mxu1 %v4159_v37  ;;  %1329 = vmatprep.mubr.bf16.mxu1 %v5199_v14  ;;  %v4295_v37 = vld [vmem:[#allocation8 + $0xe0] sm:$0xff]  }
 0x11c   : > { %1299 = vmatprep.subr.bf16.mxu1 %v4164_v38  ;;  %v4240_v38 = vld [vmem:[#allocation7 + $0x278] ss:$28 sps:$4 sm:$0xff]   ;;  %3908 = vmatprep.subr.bf16.mxu0 %v4295_v37 }
 0x11f   : > { %1300 = vmatpush1.bf16.msra.mxu1 %v4162_v39  ;;  %v4245_v39 = vld [vmem:[#allocation7 + $0x2b4] ss:$28 sps:$4 sm:$0xff]  }
 0x120   : > { %1301 = vmatprep.subr.bf16.mxu1 %v4167_v40  ;;  %v4296_v40 = vld [vmem:[#allocation8 + $0xa0] sm:$0xff]  }
 0x121   : > { %3909 = vmatpush3.bf16.msra.mxu0 %v4296_v40  ;;  %v4304_v40 = vld [vmem:[#allocation8 + $0x100] sm:$0xff]  }
 0x123   : > { %1302 = vmatpush1.bf16.msra.mxu1 %v4165_v41  ;;  %v4297_v41 = vld [vmem:[#allocation8 + $0xe8] sm:$0xff]  }
 0x124   : > { %1303 = vmatprep.subr.bf16.mxu1 %v4170_v42  ;;  %v4243_v42 = vld [vmem:[#allocation7 + $0x2b0] ss:$28 sps:$4 sm:$0xff]   ;;  %3910 = vmatprep.subr.bf16.mxu0 %v4297_v41 }
 0x125   : > { %v4305_v41 = vld [vmem:[#allocation8 + $0x148] sm:$0xff]  }
 0x127   : > { %1304 = vmatpush1.bf16.msra.mxu1 %v4168_v43  ;;  %v4248_v43 = vld [vmem:[#allocation7 + $0x2ec] ss:$28 sps:$4 sm:$0xff]  }
 0x128   : > { %1305 = vmatprep.subr.bf16.mxu1 %v4173_v44  ;;  %v4298_v44 = vld [vmem:[#allocation8 + $0xa8] sm:$0xff]  }
 0x129   : > { %3911 = vmatpush3.bf16.msra.mxu0 %v4298_v44  ;;  %v4307_v44 = vld [vmem:[#allocation8 + $0x150] sm:$0xff]  }
 0x12b   : > { %1306 = vmatpush1.bf16.msra.mxu1 %v4171_v45  ;;  %v4246_v45 = vld [vmem:[#allocation7 + $0x2e8] ss:$28 sps:$4 sm:$0xff]  }
 0x12c   : > { %1307 = vmatprep.subr.bf16.mxu1 %v4176_v46  ;;  %v4251_v46 = vld [vmem:[#allocation7 + $0x324] ss:$28 sps:$4 sm:$0xff]  }
 0x12f   : > { %1308 = vmatpush1.bf16.msra.mxu1 %v4174_v47  ;;  %v4249_v47 = vld [vmem:[#allocation7 + $0x320] ss:$28 sps:$4 sm:$0xff]  }
 0x130   : > { %1309 = vmatprep.subr.bf16.mxu1 %v4179_v48  ;;  %v4254_v48 = vld [vmem:[#allocation7 + $0x35c] ss:$28 sps:$4 sm:$0xff]  }
 0x133   : > { %1310 = vmatpush1.bf16.msra.mxu1 %v4177_v49  ;;  %v4252_v49 = vld [vmem:[#allocation7 + $0x358] ss:$28 sps:$4 sm:$0xff]  }
 0x134   : > { %1311 = vmatprep.subr.bf16.mxu1 %v4182_v50  ;;  %v4255_v50 = vld [vmem:[#allocation7 + $0x1d8] ss:$28 sps:$4 sm:$0xff]  }
 0x137   : > { %1312 = vmatpush1.bf16.msra.mxu1 %v4180_v51  ;;  %v4256_v51 = vld [vmem:[#allocation7 + $0x18] ss:$28 sps:$4 sm:$0xff]  }
 0x138   : > { %1313 = vmatprep.subr.bf16.mxu1 %v4185_v52  ;;  %v4257_v52 = vld [vmem:[#allocation7 + $0x210] ss:$28 sps:$4 sm:$0xff]  }
 0x13b   : > { %1314 = vmatpush1.bf16.msra.mxu1 %v4183_v53  ;;  %v4258_v53 = vld [vmem:[#allocation7 + $0x50] ss:$28 sps:$4 sm:$0xff]  }
 0x13c   : > { %1315 = vmatprep.subr.bf16.mxu1 %v4188_v54  ;;  %v4259_v54 = vld [vmem:[#allocation7 + $0x248] ss:$28 sps:$4 sm:$0xff]  }
 0x13f   : > { %1316 = vmatpush1.bf16.msra.mxu1 %v4186_v55  ;;  %v4260_v55 = vld [vmem:[#allocation7 + $0x88] ss:$28 sps:$4 sm:$0xff]  }
 0x140   : > { %1317 = vmatprep.subr.bf16.mxu1 %v4191_v56  ;;  %v4261_v56 = vld [vmem:[#allocation7 + $0x280] ss:$28 sps:$4 sm:$0xff]  }
 0x143   : > { %1318 = vmatpush1.bf16.msra.mxu1 %v4189_v57  ;;  %v4262_v57 = vld [vmem:[#allocation7 + $0xc0] ss:$28 sps:$4 sm:$0xff]  }
 0x144   : > { %1319 = vmatprep.subr.bf16.mxu1 %v4194_v58  ;;  %v4263_v58 = vld [vmem:[#allocation7 + $0x2b8] ss:$28 sps:$4 sm:$0xff]  }
 0x147   : > { %1320 = vmatpush1.bf16.msra.mxu1 %v4192_v59  ;;  %v4264_v59 = vld [vmem:[#allocation7 + $0xf8] ss:$28 sps:$4 sm:$0xff]  }
 0x148   : > { %1321 = vmatprep.subr.bf16.mxu1 %v4197_v60  ;;  %v4265_v60 = vld [vmem:[#allocation7 + $0x2f0] ss:$28 sps:$4 sm:$0xff]  }
 0x14b   : > { %1322 = vmatpush1.bf16.msra.mxu1 %v4195_v61  ;;  %v4266_v61 = vld [vmem:[#allocation7 + $0x130] ss:$28 sps:$4 sm:$0xff]  }
 0x14c   : > { %1323 = vmatprep.subr.bf16.mxu1 %v4200_v62  ;;  %v4267_v62 = vld [vmem:[#allocation7 + $0x328] ss:$28 sps:$4 sm:$0xff]  }
 0x14f   : > { %1324 = vmatpush1.bf16.msra.mxu1 %v4198_v63  ;;  %v4299_v63 = vld [vmem:[#allocation8 + $0xf0] sm:$0xff]  }
 0x150   : > { %1325 = vmatprep.subr.bf16.mxu1 %v4203_v0  ;;  %3912 = vmatprep.subr.bf16.mxu0 %v4299_v63  ;;  %v4268_v0 = vld [vmem:[#allocation7 + $0x168] ss:$28 sps:$4 sm:$0xff]  }
 0x153   : > { %1326 = vmatpush1.bf16.msra.mxu1 %v4201_v1  ;;  %v4269_v1 = vld [vmem:[#allocation7 + $0x360] ss:$28 sps:$4 sm:$0xff]  }
 0x154   : > { %1327 = vmatprep.subr.bf16.mxu1 %v4206_v2  ;;  %v4301_v2 = vld [vmem:[#allocation8 + $0xf8] sm:$0xff]  }
 0x157   : > { %1328 = vmatpush1.bf16.msra.mxu1 %v4204_v3  ;;  %v4302_v3 = vld [vmem:[#allocation8 + $0xb8] sm:$0xff]  }
 0x158   : > { %1338 = vmatprep.subr.bf16.mxu1 %v4209_v4  ;;  %v4270_v4 = vld [vmem:[#allocation7 + $0x1a0] ss:$28 sps:$4 sm:$0xff]  }
 0x15a   : > { %1330 = vmatmul.mubr.bf16.vlgmr.msra.gmra.mrb[4].mxu1 %v5203_v36 }
 0x15b   : > { %1339 = vmatpush1.bf16.msra.mxu1 %v4207_v5  ;;  %1370 = vmatprep.mubr.bf16.mxu1 %v5199_v14  ;;  %v4271_v5 = vld [vmem:[#allocation8 + $0x40] sm:$0xff]  }
 0x15c   : > { %1340 = vmatprep.subr.bf16.mxu1 %v4212_v6  ;;  %v4272_v6 = vld [vmem:[#allocation8] sm:$0xff]  }
 0x15f   : > { %1341 = vmatpush1.bf16.msra.mxu1 %v4210_v7  ;;  %v4273_v7 = vld [vmem:[#allocation8 + $0x48] sm:$0xff]  }
 0x160   : > { %1342 = vmatprep.subr.bf16.mxu1 %v4215_v8  ;;  %v4274_v8 = vld [vmem:[#allocation8 + $0x8] sm:$0xff]  }
 0x163   : > { %1343 = vmatpush1.bf16.msra.mxu1 %v4213_v9  ;;  %v4275_v9 = vld [vmem:[#allocation8 + $0x50] sm:$0xff]  }
 0x164   : > { %1344 = vmatprep.subr.bf16.mxu1 %v4218_v10  ;;  %v4276_v10 = vld [vmem:[#allocation8 + $0x10] sm:$0xff]  }
 0x167   : > { %1345 = vmatpush1.bf16.msra.mxu1 %v4216_v11  ;;  %v4277_v11 = vld [vmem:[#allocation8 + $0x58] sm:$0xff]  }
 0x168   : > { %1346 = vmatprep.subr.bf16.mxu1 %v4221_v12  ;;  %v4278_v12 = vld [vmem:[#allocation8 + $0x18] sm:$0xff]  }
 0x16b   : > { %1347 = vmatpush1.bf16.msra.mxu1 %v4219_v13  ;;  %v4279_v13 = vld [vmem:[#allocation8 + $0x60] sm:$0xff]  }
 0x16c   : > { %1348 = vmatprep.subr.bf16.mxu1 %v4224_v15  ;;  %v4280_v15 = vld [vmem:[#allocation8 + $0x20] sm:$0xff]  }
 0x16f   : > { %1349 = vmatpush1.bf16.msra.mxu1 %v4222_v16  ;;  %v4281_v16 = vld [vmem:[#allocation8 + $0x68] sm:$0xff]  }
 0x170   : > { %1350 = vmatprep.subr.bf16.mxu1 %v4227_v17  ;;  %v4282_v17 = vld [vmem:[#allocation8 + $0x28] sm:$0xff]  }
 0x173   : > { %1351 = vmatpush1.bf16.msra.mxu1 %v4225_v18  ;;  %v4284_v18 = vld [vmem:[#allocation8 + $0x30] sm:$0xff]  }
 0x174   : > { %1352 = vmatprep.subr.bf16.mxu1 %v4230_v19  ;;  %v4285_v19 = vld [vmem:[#allocation8 + $0x78] sm:$0xff]  }
 0x177   : > { %1353 = vmatpush1.bf16.msra.mxu1 %v4228_v20  ;;  %v4286_v20 = vld [vmem:[#allocation8 + $0x38] sm:$0xff]  }
 0x178   : > { %1354 = vmatprep.subr.bf16.mxu1 %v4233_v21  ;;  %v4303_v21 = vld [vmem:[#allocation8 + $0x140] sm:$0xff]  }
 0x17b   : > { %1355 = vmatpush1.bf16.msra.mxu1 %v4231_v25  ;;  %v5220_v25 = vld [vmem:[%s5398_s3] sm:$0xff] }
 0x17c   : > { %1356 = vmatprep.subr.bf16.mxu1 %v4236_v26  ;;  %v5223_v26 = vsub.s32 1, %v5212_v23 }
 0x17e   : > { %v652_v28 = vrot.slane %v5220_v25, %v5223_v26 }
 0x17f   : > { %1357 = vmatpush1.bf16.msra.mxu1 %v4234_v27  ;;  %v648_v27 = vrot.slane %v5220_v25, %v5215_v24 }
 0x180   : > { %1358 = vmatprep.subr.bf16.mxu1 %v4239_v30 }
 0x183   : > { %1359 = vmatpush1.bf16.msra.mxu1 %v4237_v33 }
 0x184   : > { %1360 = vmatprep.subr.bf16.mxu1 %v4242_v34 }
 0x187   : > { %1361 = vmatpush1.bf16.msra.mxu1 %v4240_v38 }
 0x188   : > { %1362 = vmatprep.subr.bf16.mxu1 %v4245_v39 }
 0x18b   : > { %1363 = vmatpush1.bf16.msra.mxu1 %v4243_v42  ;;  %v4306_v42 = vld [vmem:[#allocation8 + $0x108] sm:$0xff]  }
 0x18c   : > { %1364 = vmatprep.subr.bf16.mxu1 %v4248_v43  ;;  %v4845_v43 = vmov 0.0  }
 0x18f   : > { %1365 = vmatpush1.bf16.msra.mxu1 %v4246_v45  ;;  %v4308_v45 = vld [vmem:[#allocation8 + $0x110] sm:$0xff]  }
 0x190   : > { %1366 = vmatprep.subr.bf16.mxu1 %v4251_v46  ;;  %v4309_v46 = vld [vmem:[#allocation8 + $0x158] sm:$0xff]  }
 0x193   : > { %1367 = vmatpush1.bf16.msra.mxu1 %v4249_v47  ;;  %v4310_v47 = vld [vmem:[#allocation8 + $0x118] sm:$0xff]  }
 0x194   : > { %1368 = vmatprep.subr.bf16.mxu1 %v4254_v48  ;;  %v4311_v48 = vld [vmem:[#allocation8 + $0x160] sm:$0xff]  }
 0x197   : > { %1369 = vmatpush1.bf16.msra.mxu1 %v4252_v49  ;;  %v4312_v49 = vld [vmem:[#allocation8 + $0x120] sm:$0xff]  }
 0x198   : > { %3856 = vmatprep.subr.bf16.mxu1 %v4255_v50  ;;  %v4313_v50 = vld [vmem:[#allocation8 + $0x168] sm:$0xff]  }
 0x19a   : > { %1371 = vmatmul.mubr.bf16.vlgmr.msra.gmra.mrb[8].mxu1 %v5203_v36 }
 0x19b   : > { %3857 = vmatpush3.bf16.msra.mxu1 %v4256_v51  ;;  %1411 = vmatprep.mubr.bf16.mxu1 %v5199_v14  ;;  %v4300_v14 = vld [vmem:[#allocation8 + $0xb0] sm:$0xff]   ;;  %v4314_v51 = vld [vmem:[#allocation8 + $0x128] sm:$0xff]  }
 0x19c   : > { %3858 = vmatprep.subr.bf16.mxu1 %v4257_v52  ;;  %3913 = vmatpush3.bf16.msra.mxu0 %v4300_v14  ;;  %v4315_v52 = vld [vmem:[#allocation8 + $0x170] sm:$0xff]  }
 0x19d   : > { %3914 = vmatprep.subr.bf16.mxu0 %v4301_v2 }
 0x19f   : > { %3859 = vmatpush3.bf16.msra.mxu1 %v4258_v53  ;;  %v4316_v53 = vld [vmem:[#allocation8 + $0x130] sm:$0xff]  }
 0x1a0   : > { %3860 = vmatprep.subr.bf16.mxu1 %v4259_v54  ;;  %3915 = vmatpush3.bf16.msra.mxu0 %v4302_v3  ;;  %v4317_v54 = vld [vmem:[#allocation8 + $0x178] sm:$0xff]  }
 0x1a1   : > { %3958 = vmatprep.subr.bf16.mxu0 %v4845_v43 }
 0x1a3   : > { %3861 = vmatpush3.bf16.msra.mxu1 %v4260_v55  ;;  %v4318_v55 = vld [vmem:[#allocation8 + $0x138] sm:$0xff]  }
 0x1a4   : > { %3862 = vmatprep.subr.bf16.mxu1 %v4261_v56  ;;  %v655_v56 = vsub.s32 2, %v5212_v23 }
 0x1a7   : > { %3863 = vmatpush3.bf16.msra.mxu1 %v4262_v57  ;;  %v659_v57 = vsub.s32 3, %v5212_v23 }
 0x1a8   : > { %3864 = vmatprep.subr.bf16.mxu1 %v4263_v58  ;;  %v656_v58 = vrot.slane %v5220_v25, %v655_v56 }
 0x1ab   : > { %3865 = vmatpush3.bf16.msra.mxu1 %v4264_v59  ;;  %v660_v59 = vrot.slane %v5220_v25, %v659_v57 }
 0x1ac   : > { %3866 = vmatprep.subr.bf16.mxu1 %v4265_v60 }
 0x1af   : > { %3867 = vmatpush3.bf16.msra.mxu1 %v4266_v61 }
 0x1b0   : > { %3868 = vmatprep.subr.bf16.mxu1 %v4267_v62 }
 0x1b3   : > { %3869 = vmatpush3.bf16.msra.mxu1 %v4268_v0 }
 0x1b4   : > { %3870 = vmatprep.subr.bf16.mxu1 %v4269_v1 }
 0x1b7   : > { %3871 = vmatpush3.bf16.msra.mxu1 %v4270_v4 }
 0x1b8   : > { %3878 = vmatprep.subr.bf16.mxu1 %v4271_v5  ;;  %v4319_v5 = vld [vmem:[#allocation8 + $0x180] sm:$0xff]  }
 0x1ba   : > { %1412 = vmatmul.mubr.bf16.vlgmr.msra.gmra.mrb[12].mxu1 %v5203_v36  ;;  %v4283_v36 = vld [vmem:[#allocation8 + $0x70] sm:$0xff]  }
 0x1bb   : > { %3879 = vmatpush3.bf16.msra.mxu1 %v4272_v6  ;;  %v4320_v6 = vld [vmem:[#allocation8 + $0x188] sm:$0xff]  }
 0x1bc   : > { %3880 = vmatprep.subr.bf16.mxu1 %v4273_v7  ;;  %v4321_v7 = vld [vmem:[#allocation8 + $0x190] sm:$0xff]  }
 0x1bf   : > { %3881 = vmatpush3.bf16.msra.mxu1 %v4274_v8  ;;  %v4322_v8 = vld [vmem:[#allocation8 + $0x198] sm:$0xff]  }
 0x1c0   : > { %3882 = vmatprep.subr.bf16.mxu1 %v4275_v9  ;;  %v4323_v9 = vld [vmem:[#allocation8 + $0x1a0] sm:$0xff]  }
 0x1c3   : > { %3883 = vmatpush3.bf16.msra.mxu1 %v4276_v10  ;;  %v4324_v10 = vld [vmem:[#allocation8 + $0x1a8] sm:$0xff]  }
 0x1c4   : > { %3884 = vmatprep.subr.bf16.mxu1 %v4277_v11  ;;  %v4325_v11 = vld [vmem:[#allocation8 + $0x1b0] sm:$0xff]  }
 0x1c7   : > { %3885 = vmatpush3.bf16.msra.mxu1 %v4278_v12  ;;  %v4326_v12 = vld [vmem:[#allocation8 + $0x1b8] sm:$0xff]  }
 0x1c8   : > { %3886 = vmatprep.subr.bf16.mxu1 %v4279_v13  ;;  %v663_v13 = vsub.s32 4, %v5212_v23 }
 0x1cb   : > { %3887 = vmatpush3.bf16.msra.mxu1 %v4280_v15  ;;  %v667_v15 = vsub.s32 5, %v5212_v23 }
 0x1cc   : > { %3888 = vmatprep.subr.bf16.mxu1 %v4281_v16  ;;  %v664_v16 = vrot.slane %v5220_v25, %v663_v13 }
 0x1cf   : > { %3889 = vmatpush3.bf16.msra.mxu1 %v4282_v17  ;;  %v668_v17 = vrot.slane %v5220_v25, %v667_v15 }
 0x1d0   : > { %3890 = vmatprep.subr.bf16.mxu1 %v4283_v36 }
 0x1d3   : > { %3891 = vmatpush3.bf16.msra.mxu1 %v4284_v18 }
 0x1d4   : > { %3892 = vmatprep.subr.bf16.mxu1 %v4285_v19 }
 0x1d7   : > { %3893 = vmatpush3.bf16.msra.mxu1 %v4286_v20 }
 0x1d8   : > { %3922 = vmatprep.subr.bf16.mxu1 %v4303_v21 }
 0x1ed   : > { %v1290_v29 = vpop.f32.mrb[0].mxu1 }
 0x1ee   : > { %v1291_v30 = vadd.f32 %v1290_v29, %v648_v27  ;;  %v1292_v31 = vpop.f32.mrb[1].mxu1 }
 0x1ef   : > { %v1293_v32 = vadd.f32 %v1292_v31, %v652_v28  ;;  %v1294_v33 = vpop.f32.mrb[2].mxu1  ;;  %v671_v31 = vsub.s32 6, %v5212_v23 }
 0x1f0   : > { %v1419_v34 = vmax.f32 %v1291_v30, 0.0  ;;  %v1295_v35 = vpop.f32.mrb[3].mxu1 }
 0x1f1   : > { %v1420_v37 = vmax.f32 %v1293_v32, 0.0  ;;  %v672_v33 = vrot.slane %v5220_v25, %v671_v31  ;;  %v4338_v25 = vld [vmem:[#allocation10 + $0x44] ss:$28 sps:$4 sm:$0xff]  }
 0x1f2   : > { %v1426_v38 = vpack.c.bf16 %v1419_v34, %v1419_v34 }
 0x1f3   : > { %v1427_v39 = vpack.c.bf16 %v1420_v37, %v1420_v37 }
 0x1f5   : > { %1920 = vmatprep.mubr.bf16.mxu1 %v1427_v39 }
 0x1f6   : > { %1921 = vmatmul.mubr.bf16.vlgmr.msra.gmra.mrb[16].mxu1 %v1426_v38 }
 0x1f7   : > { %3923 = vmatpush3.bf16.msra.mxu1 %v4304_v40 }
 0x1f8   : > { %3924 = vmatprep.subr.bf16.mxu1 %v4305_v41 }
 0x1fb   : > { %3925 = vmatpush3.bf16.msra.mxu1 %v4306_v42 }
 0x1fc   : > { %3926 = vmatprep.subr.bf16.mxu1 %v4307_v44 }
 0x1ff   : > { %3927 = vmatpush3.bf16.msra.mxu1 %v4308_v45 }
 0x200   : > { %3928 = vmatprep.subr.bf16.mxu1 %v4309_v46 }
 0x203   : > { %3929 = vmatpush3.bf16.msra.mxu1 %v4310_v47 }
 0x204   : > { %3930 = vmatprep.subr.bf16.mxu1 %v4311_v48  ;;  %v4327_v48 = vld [vmem:[#allocation10] ss:$28 sps:$4 sm:$0xff]  }
 0x207   : > { %3931 = vmatpush3.bf16.msra.mxu1 %v4312_v49  ;;  %v4329_v49 = vld [vmem:[#allocation10 + $0x4] ss:$28 sps:$4 sm:$0xff]  }
 0x208   : > { %3932 = vmatprep.subr.bf16.mxu1 %v4313_v50  ;;  %v4330_v50 = vld [vmem:[#allocation10 + $0x8] ss:$28 sps:$4 sm:$0xff]  }
 0x20b   : > { %3933 = vmatpush3.bf16.msra.mxu1 %v4314_v51  ;;  %v4332_v51 = vld [vmem:[#allocation10 + $0xc] ss:$28 sps:$4 sm:$0xff]  }
 0x20c   : > { %3934 = vmatprep.subr.bf16.mxu1 %v4315_v52  ;;  %v4335_v52 = vld [vmem:[#allocation10 + $0x3c] ss:$28 sps:$4 sm:$0xff]  }
 0x20f   : > { %3935 = vmatpush3.bf16.msra.mxu1 %v4316_v53  ;;  %v4333_v53 = vld [vmem:[#allocation10 + $0x38] ss:$28 sps:$4 sm:$0xff]  }
 0x210   : > { %3936 = vmatprep.subr.bf16.mxu1 %v4317_v54  ;;  %v4336_v54 = vld [vmem:[#allocation10 + $0x40] ss:$28 sps:$4 sm:$0xff]  }
 0x213   : > { %3937 = vmatpush3.bf16.msra.mxu1 %v4318_v55  ;;  %v4341_v55 = vld [vmem:[#allocation10 + $0x74] ss:$28 sps:$4 sm:$0xff]  }
 0x214   : > { %2316 = vmatprep.subr.bf16.mxu1 %v4332_v51  ;;  %v4372_v51 = vld [vmem:[#allocation11 + $0x14] ss:$8 sps:$4 sm:$0xff]  }
 0x22d   : > { %v1331_v60 = vpop.f32.mrb[4].mxu1 }
 0x22e   : > { %v1332_v61 = vadd.f32 %v1331_v60, %v656_v58  ;;  %v1333_v62 = vpop.f32.mrb[5].mxu1  ;;  %v4344_v58 = vld [vmem:[#allocation10 + $0x7c] ss:$28 sps:$4 sm:$0xff]  }
 0x22f   : > { %v1334_v63 = vadd.f32 %v1333_v62, %v660_v59  ;;  %v1335_v14 = vpop.f32.mrb[6].mxu1  ;;  %v4339_v59 = vld [vmem:[#allocation10 + $0x70] ss:$28 sps:$4 sm:$0xff]   ;;  %v4342_v60 = vld [vmem:[#allocation10 + $0x78] ss:$28 sps:$4 sm:$0xff]  }
 0x230   : > { %v1421_v0 = vmax.f32 %v1332_v61, 0.0  ;;  %v1336_v1 = vpop.f32.mrb[7].mxu1  ;;  %v3644_v61 = vld [vmem:[%s5400_s5] ss:$0 sm:$0xff] }
 0x231   : > { %v1422_v2 = vmax.f32 %v1334_v63, 0.0 }
 0x232   : > { %v1428_v3 = vpack.c.bf16 %v1421_v0, %v1421_v0 }
 0x233   : > { %v1429_v4 = vpack.c.bf16 %v1422_v2, %v1422_v2 }
 0x235   : > { %1960 = vmatprep.mubr.bf16.mxu0 %v1429_v4 }
 0x236   : > { %1961 = vmatmul.mubr.bf16.vlgmr.msra.gmra.mrb[0].mxu0 %v1428_v3 }
 0x237   : > { %3959 = vmatpush3.bf16.msra.mxu0 %v4319_v5  ;;  %3974 = vmatprep.mubr.msk.bf16.mxu0 %vm4846_vm0, %v4845_v43 }
 0x238   : > { %3960 = vmatprep.subr.bf16.mxu0 %v4845_v43 }
 0x23b   : > { %3961 = vmatpush3.bf16.msra.mxu0 %v4320_v6 }
 0x23c   : > { %3962 = vmatprep.subr.bf16.mxu0 %v4845_v43 }
 0x23f   : > { %3963 = vmatpush3.bf16.msra.mxu0 %v4321_v7 }
 0x240   : > { %3964 = vmatprep.subr.bf16.mxu0 %v4845_v43 }
 0x243   : > { %3965 = vmatpush3.bf16.msra.mxu0 %v4322_v8 }
 0x244   : > { %3966 = vmatprep.subr.bf16.mxu0 %v4845_v43 }
 0x247   : > { %3967 = vmatpush3.bf16.msra.mxu0 %v4323_v9 }
 0x248   : > { %3968 = vmatprep.subr.bf16.mxu0 %v4845_v43 }
 0x24b   : > { %3969 = vmatpush3.bf16.msra.mxu0 %v4324_v10 }
 0x24c   : > { %3970 = vmatprep.subr.bf16.mxu0 %v4845_v43 }
 0x24f   : > { %3971 = vmatpush3.bf16.msra.mxu0 %v4325_v11 }
 0x250   : > { %3972 = vmatprep.subr.bf16.mxu0 %v4845_v43 }
 0x253   : > { %3973 = vmatpush3.bf16.msra.mxu0 %v4326_v12 }
 0x254   : > { %2275 = vmatprep.subr.bf16.mxu0 %v4329_v49  ;;  %v4369_v49 = vld [vmem:[#allocation11 + $0x4] ss:$8 sps:$4 sm:$0xff]  }
 0x26d   : > { %v1372_v36 = vpop.f32.mrb[8].mxu1 }
 0x26e   : > { %v1373_v18 = vadd.f32 %v1372_v36, %v664_v16  ;;  %v1374_v19 = vpop.f32.mrb[9].mxu1 }
 0x26f   : > { %v1375_v20 = vadd.f32 %v1374_v19, %v668_v17  ;;  %v1376_v21 = vpop.f32.mrb[10].mxu1  ;;  %v4350_v19 = vld [vmem:[#allocation10 + $0xb4] ss:$28 sps:$4 sm:$0xff]  }
 0x270   : > { %v1423_v22 = vmax.f32 %v1373_v18, 0.0  ;;  %v1377_v27 = vpop.f32.mrb[11].mxu1  ;;  %v4347_v18 = vld [vmem:[#allocation10 + $0xac] ss:$28 sps:$4 sm:$0xff]  }
 0x271   : > { %v1424_v28 = vmax.f32 %v1375_v20, 0.0  ;;  %v4345_v21 = vld [vmem:[#allocation10 + $0xa8] ss:$28 sps:$4 sm:$0xff]   ;;  %v4353_v27 = vld [vmem:[#allocation10 + $0x14] ss:$28 sps:$4 sm:$0xff]  }
 0x272   : > { %v1430_v29 = vpack.c.bf16 %v1423_v22, %v1423_v22  ;;  %v4348_v22 = vld [vmem:[#allocation10 + $0xb0] ss:$28 sps:$4 sm:$0xff]  }
 0x273   : > { %v1431_v30 = vpack.c.bf16 %v1424_v28, %v1424_v28  ;;  %v4847_v28 = vmov 0  }
 0x275   : > { %2000 = vmatprep.mubr.bf16.mxu1 %v1431_v30  ;;  %v512_v30 = vld [vmem:[%s5180_s11] sm:$0xff]  ;;  %s3321_s11 = scalar_lea.sflag [#allocation15], %s5164_s6 }
 0x276   : > { %2001 = vmatmul.mubr.bf16.vlgmr.msra.gmra.mrb[20].mxu1 %v1430_v29 }
 0x277   : > { %2317 = vmatpush1.bf16.msra.mxu1 %v4330_v50  ;;  %2348 = vmatprep.mubr.bf16.mxu1 %v4847_v28  ;;  %v4367_v50 = vld [vmem:[#allocation11] ss:$8 sps:$4 sm:$0xff]  }
 0x278   : > { %2318 = vmatprep.subr.bf16.mxu1 %v4338_v25  ;;  %v4375_v25 = vld [vmem:[#allocation11 + $0x24] ss:$8 sps:$4 sm:$0xff]  }
 0x27b   : > { %2319 = vmatpush1.bf16.msra.mxu1 %v4336_v54  ;;  %v4378_v54 = vld [vmem:[#allocation11 + $0x34] ss:$8 sps:$4 sm:$0xff]  }
 0x27c   : > { %2320 = vmatprep.subr.bf16.mxu1 %v4344_v58  ;;  %v4379_v58 = vld [vmem:[#allocation11 + $0x40] ss:$8 sps:$4 sm:$0xff]  }
 0x27f   : > { %2321 = vmatpush1.bf16.msra.mxu1 %v4342_v60  ;;  %v4382_v60 = vld [vmem:[#allocation11 + $0x50] ss:$8 sps:$4 sm:$0xff]  }
 0x280   : > { %2322 = vmatprep.subr.bf16.mxu1 %v4350_v19  ;;  %v5284_v19 = vld [vmem:[%s5402_s7] sm:$0xff] }
 0x283   : > { %2323 = vmatpush1.bf16.msra.mxu1 %v4348_v22  ;;  %v2107_v22 = vrot.slane %v5284_v19, %v659_v57 }
 0x284   : > { %3978 = vmatprep.subr.bf16.mxu1 %v4845_v43 }
 0x28d   : > { %v3872_v32 = vpop.f32.mrb[12].mxu1 }
 0x28e   : > { %v3873_v34 = vpop.f32.mrb[13].mxu1 }
 0x28f   : > { %v3874_v35 = vadd.f32 %v3873_v34, %v3872_v32  ;;  %v3875_v37 = vpop.f32.mrb[14].mxu1 }
 0x290   : > { %v3876_v38 = vpop.f32.mrb[15].mxu1  ;;  %v4354_v37 = vld [vmem:[#allocation10 + $0x18] ss:$28 sps:$4 sm:$0xff]  }
 0x291   : > { %v1414_v39 = vadd.f32 %v3874_v35, %v672_v33  ;;  %v4351_v35 = vld [vmem:[#allocation10 + $0x10] ss:$28 sps:$4 sm:$0xff]  }
 0x293   : > { %v1425_v40 = vmax.f32 %v1414_v39, 0.0  ;;  %v4357_v39 = vld [vmem:[#allocation10 + $0x4c] ss:$28 sps:$4 sm:$0xff]  }
 0x295   : > { %v1432_v41 = vpack.c.bf16 %v1425_v40, %v1425_v40  ;;  %v4355_v40 = vld [vmem:[#allocation10 + $0x48] ss:$28 sps:$4 sm:$0xff]  }
 0x297   : > { %3975 = vmatmul.mubr.bf16.vlgmr.msra.gmra.mrb[4].mxu0 %v1432_v41  ;;  %v4358_v41 = vld [vmem:[#allocation10 + $0x50] ss:$28 sps:$4 sm:$0xff]  }
 0x298   : > { %2276 = vmatpush1.bf16.msra.mxu0 %v4327_v48  ;;  %2307 = vmatprep.mubr.bf16.mxu0 %v4847_v28  ;;  %v4366_v48 = vld [vmem:[#allocation10 + $0xc0] ss:$28 sps:$4 sm:$0xff]  }
 0x299   : > { %2277 = vmatprep.subr.bf16.mxu0 %v4335_v52  ;;  %v4370_v52 = vld [vmem:[#allocation11 + $0x10] ss:$8 sps:$4 sm:$0xff]  }
 0x29c   : > { %2278 = vmatpush1.bf16.msra.mxu0 %v4333_v53  ;;  %v4373_v53 = vld [vmem:[#allocation11 + $0x20] ss:$8 sps:$4 sm:$0xff]  }
 0x29d   : > { %2279 = vmatprep.subr.bf16.mxu0 %v4341_v55  ;;  %v4381_v55 = vld [vmem:[#allocation11 + $0x44] ss:$8 sps:$4 sm:$0xff]  }
 0x2a0   : > { %2280 = vmatpush1.bf16.msra.mxu0 %v4339_v59  ;;  %v4384_v59 = vld [vmem:[#allocation11 + $0x54] ss:$8 sps:$4 sm:$0xff]  }
 0x2a1   : > { %2281 = vmatprep.subr.bf16.mxu0 %v4347_v18  ;;  %v4417_v18 = vld [vmem:[#allocation11 + $0x104] ss:$8 sps:$4 sm:$0xff]  }
 0x2a4   : > { %2282 = vmatpush1.bf16.msra.mxu0 %v4345_v21  ;;  %v2099_v21 = vrot.slane %v5284_v19, %v5223_v26 }
 0x2a5   : > { %2357 = vmatprep.subr.bf16.mxu0 %v4353_v27 }
 0x2c9   : > { %v3894_v42 = vpop.f32.mrb[16].mxu1 }
 0x2ca   : > { %v3895_v44 = vpop.f32.mrb[17].mxu1 }
 0x2cb   : > { %v3896_v45 = vadd.f32 %v3895_v44, %v3894_v42  ;;  %v3897_v46 = vpop.f32.mrb[18].mxu1  ;;  %v4361_v42 = vld [vmem:[#allocation10 + $0x84] ss:$28 sps:$4 sm:$0xff]  }
 0x2cc   : > { %v3898_v47 = vpop.f32.mrb[19].mxu1  ;;  %v4359_v44 = vld [vmem:[#allocation10 + $0x80] ss:$28 sps:$4 sm:$0xff]  }
 0x2cd   : > { %v1923_v14 = vadd.f32 %v3896_v45, %v3644_v61  ;;  %v4362_v45 = vld [vmem:[#allocation10 + $0x88] ss:$28 sps:$4 sm:$0xff]   ;;  %v4365_v46 = vld [vmem:[#allocation10 + $0xbc] ss:$28 sps:$4 sm:$0xff]  }
 0x2ce   : > { %v4363_v47 = vld [vmem:[#allocation10 + $0xb8] ss:$28 sps:$4 sm:$0xff]   ;;  %v4387_v61 = vld [vmem:[#allocation11 + $0x64] ss:$8 sps:$4 sm:$0xff]  }
 0x309   : > { %v3916_v62 = vpop.f32.mrb[0].mxu0 }
 0x30a   : > { %v3917_v63 = vpop.f32.mrb[1].mxu0 }
 0x30b   : > { %v3918_v0 = vadd.f32 %v3917_v63, %v3916_v62  ;;  %v3919_v1 = vpop.f32.mrb[2].mxu0  ;;  %v4385_v62 = vld [vmem:[#allocation11 + $0x60] ss:$8 sps:$4 sm:$0xff]   ;;  %v4390_v63 = vld [vmem:[#allocation11 + $0x74] ss:$8 sps:$4 sm:$0xff]  }
 0x30c   : > { %v3920_v2 = vpop.f32.mrb[3].mxu0  ;;  %v4391_v1 = vld [vmem:[#allocation11 + $0x80] ss:$8 sps:$4 sm:$0xff]  }
 0x30d   : > { %v1963_v3 = vadd.f32 %v3918_v0, %v1923_v14  ;;  %v4388_v14 = vld [vmem:[#allocation11 + $0x70] ss:$8 sps:$4 sm:$0xff]   ;;  %v4393_v0 = vld [vmem:[#allocation11 + $0x84] ss:$8 sps:$4 sm:$0xff]   ;;  %v4396_v2 = vld [vmem:[#allocation11 + $0x94] ss:$8 sps:$4 sm:$0xff]  }
 0x349   : > { %v3938_v4 = vpop.f32.mrb[20].mxu1 }
 0x34a   : > { %v3939_v5 = vpop.f32.mrb[21].mxu1 }
 0x34b   : > { %v3940_v6 = vadd.f32 %v3939_v5, %v3938_v4  ;;  %v3941_v7 = vpop.f32.mrb[22].mxu1  ;;  %v4399_v4 = vld [vmem:[#allocation11 + $0xa4] ss:$8 sps:$4 sm:$0xff]   ;;  %v4397_v5 = vld [vmem:[#allocation11 + $0xa0] ss:$8 sps:$4 sm:$0xff]  }
 0x34c   : > { %v3942_v8 = vpop.f32.mrb[23].mxu1  ;;  %v4400_v7 = vld [vmem:[#allocation11 + $0xb0] ss:$8 sps:$4 sm:$0xff]  }
 0x34d   : > { %v2003_v9 = vadd.f32 %v3940_v6, %v1963_v3  ;;  %v4394_v3 = vld [vmem:[#allocation11 + $0x90] ss:$8 sps:$4 sm:$0xff]   ;;  %v4402_v6 = vld [vmem:[#allocation11 + $0xb4] ss:$8 sps:$4 sm:$0xff]   ;;  %v4405_v8 = vld [vmem:[#allocation11 + $0xc4] ss:$8 sps:$4 sm:$0xff]  }
 0x36a   : > { %v2042_v10 = vpop.f32.mrb[4].mxu0 }
 0x36b   : > { %v2043_v11 = vadd.f32 %v2042_v10, %v2003_v9  ;;  %v3976_v12 = vpop.f32.mrb[5].mxu0  ;;  %v4403_v9 = vld [vmem:[#allocation11 + $0xc0] ss:$8 sps:$4 sm:$0xff]   ;;  %v4408_v10 = vld [vmem:[#allocation11 + $0xd4] ss:$8 sps:$4 sm:$0xff]  }
 0x36c   : > { %v2045_v16 = vpop.f32.mrb[6].mxu0  ;;  %v4411_v12 = vld [vmem:[#allocation11 + $0xe4] ss:$8 sps:$4 sm:$0xff]  }
 0x36d   : > { %v2048_v17 = vmul.f32 0.5, %v2043_v11  ;;  %3314 = vst [vmem:[%s5264_s29] sm:$0xff] %v2043_v11  ;;  %v3977_v36 = vpop.f32.mrb[7].mxu0  ;;  %v4409_v16 = vld [vmem:[#allocation11 + $0xe0] ss:$8 sps:$4 sm:$0xff]  }
 0x36e   : > { %v4412_v36 = vld [vmem:[#allocation11 + $0xf0] ss:$8 sps:$4 sm:$0xff]  }
 0x36f   : > { %v2049_v20 = vmul.f32 1.442695, %v2048_v17  ;;  %v4414_v17 = vld [vmem:[#allocation11 + $0xf4] ss:$8 sps:$4 sm:$0xff]  }
 0x371   : > { %4535 = vpow2.f32 %v2049_v20  ;;  %v2095_v20 = vrot.slane %v5284_v19, %v5215_v24 }
 0x37b   : > { %v4536_v29 = vpop.eup %4535 }
 0x37c   : > { %2052 = vrot.lane.b32.xlu0 %v4536_v29, %s4848_s2 }
 0x3ee   : > { %v2053_v32 = vpop.permute.xlu0 %2052 }
 0x3ef   : > { %v2055_v33 = vmul.f32 %v2053_v32, %v512_v30 }
 0x3f1   : > { %v2056_v34 = vadd.f32 %v2055_v33, %v2043_v11  ;;  %v4406_v11 = vld [vmem:[#allocation11 + $0xd0] ss:$8 sps:$4 sm:$0xff]  }
 0x3f3   : > { %v2057_v38 = vpack.c.bf16 %v2056_v34, %v2056_v34 }
 0x3f5   : > { %3729 = vmatmul.mubr.msk.bf16.vlgmr.msra.gmra.mrb[8].mxu0 %vm2271_vm1, %v2057_v38  ;;  %3730 = vmatmul.mubr.msk.bf16.vlgmr.msra.gmra.mrb[24].mxu1 %vm2271_vm1, %v2057_v38 }
 0x3f6   : > { %2358 = vmatpush1.bf16.msra.mxu0 %v4351_v35  ;;  %3979 = vmatpush3.bf16.msra.mxu1 %v4354_v37 }
 0x3f7   : > { %2359 = vmatprep.subr.bf16.mxu0 %v4357_v39  ;;  %3980 = vmatprep.subr.bf16.mxu1 %v4845_v43 }
 0x3f8   : > { %2389 = vmatprep.mubr.bf16.mxu0 %v4847_v28  ;;  %3986 = vmatprep.mubr.msk.bf16.mxu1 %vm4846_vm0, %v4845_v43 }
 0x3fa   : > { %2360 = vmatpush1.bf16.msra.mxu0 %v4355_v40  ;;  %3981 = vmatpush3.bf16.msra.mxu1 %v4358_v41 }
 0x3fb   : > { %2361 = vmatprep.subr.bf16.mxu0 %v4361_v42  ;;  %3982 = vmatprep.subr.bf16.mxu1 %v4845_v43 }
 0x3fe   : > { %2362 = vmatpush1.bf16.msra.mxu0 %v4359_v44  ;;  %3983 = vmatpush3.bf16.msra.mxu1 %v4362_v45 }
 0x3ff   : > { %2363 = vmatprep.subr.bf16.mxu0 %v4365_v46  ;;  %3984 = vmatprep.subr.bf16.mxu1 %v4845_v43  ;;  %v4376_v43 = vld [vmem:[#allocation11 + $0x30] ss:$8 sps:$4 sm:$0xff]   ;;  %v4415_v46 = vld [vmem:[#allocation11 + $0x100] ss:$8 sps:$4 sm:$0xff]  }
 0x402   : > { %2364 = vmatpush1.bf16.msra.mxu0 %v4363_v47  ;;  %3985 = vmatpush3.bf16.msra.mxu1 %v4366_v48  ;;  %v4420_v48 = vld [vmem:[#allocation11 + $0x114] ss:$8 sps:$4 sm:$0xff]  }
 0x403   : > { %3136 = vmatprep.subr.bf16.mxu0 %v4369_v49  ;;  %v4418_v49 = vld [vmem:[#allocation11 + $0x110] ss:$8 sps:$4 sm:$0xff]  }
 0x405   : > { %3731 = vmatmul.mubr.msk.bf16.vlgmr.msra.gmra.mrb[12].mxu0 %vm2271_vm1, %v2057_v38  ;;  %3987 = vmatmul.mubr.msk.bf16.vlgmr.msra.gmra.mrb[28].mxu1 %vm2271_vm1, %v2057_v38 }
 0x406   : > { %3137 = vmatpush1.bf16.msra.mxu0 %v4367_v50  ;;  %v4423_v50 = vld [vmem:[#allocation11 + $0x124] ss:$8 sps:$4 sm:$0xff]  }
 0x407   : > { %3138 = vmatprep.subr.bf16.mxu0 %v4372_v51  ;;  %v4421_v51 = vld [vmem:[#allocation11 + $0x120] ss:$8 sps:$4 sm:$0xff]  }
 0x40a   : > { %3139 = vmatpush1.bf16.msra.mxu0 %v4370_v52  ;;  %v4426_v52 = vld [vmem:[#allocation11 + $0x134] ss:$8 sps:$4 sm:$0xff]  }
 0x40b   : > { %3140 = vmatprep.subr.bf16.mxu0 %v4375_v25 }
 0x40e   : > { %3141 = vmatpush1.bf16.msra.mxu0 %v4373_v53 }
 0x40f   : > { %3142 = vmatprep.subr.bf16.mxu0 %v4378_v54 }
 0x412   : > { %3143 = vmatpush1.bf16.msra.mxu0 %v4376_v43 }
 0x413   : > { %3144 = vmatprep.subr.bf16.mxu0 %v4381_v55 }
 0x416   : > { %3145 = vmatpush1.bf16.msra.mxu0 %v4379_v58 }
 0x417   : > { %3146 = vmatprep.subr.bf16.mxu0 %v4384_v59  ;;  %v4424_v59 = vld [vmem:[#allocation11 + $0x130] ss:$8 sps:$4 sm:$0xff]  }
 0x41a   : > { %3147 = vmatpush1.bf16.msra.mxu0 %v4382_v60 }
 0x41b   : > { %3148 = vmatprep.subr.bf16.mxu0 %v4387_v61 }
 0x41e   : > { %3149 = vmatpush1.bf16.msra.mxu0 %v4385_v62  ;;  %v4429_v62 = vld [vmem:[#allocation11 + $0x144] ss:$8 sps:$4 sm:$0xff]  }
 0x41f   : > { %3150 = vmatprep.subr.bf16.mxu0 %v4390_v63  ;;  %v4427_v63 = vld [vmem:[#allocation11 + $0x140] ss:$8 sps:$4 sm:$0xff]  }
 0x422   : > { %3151 = vmatpush1.bf16.msra.mxu0 %v4388_v14  ;;  %v4432_v14 = vld [vmem:[#allocation11 + $0x154] ss:$8 sps:$4 sm:$0xff]  }
 0x423   : > { %3152 = vmatprep.subr.bf16.mxu0 %v4393_v0  ;;  %v4430_v0 = vld [vmem:[#allocation11 + $0x150] ss:$8 sps:$4 sm:$0xff]  }
 0x426   : > { %3153 = vmatpush1.bf16.msra.mxu0 %v4391_v1  ;;  %v4435_v1 = vld [vmem:[#allocation11 + $0x164] ss:$8 sps:$4 sm:$0xff]  }
 0x427   : > { %3154 = vmatprep.subr.bf16.mxu0 %v4396_v2  ;;  %v4433_v2 = vld [vmem:[#allocation11 + $0x160] ss:$8 sps:$4 sm:$0xff]  }
 0x42a   : > { %3155 = vmatpush1.bf16.msra.mxu0 %v4394_v3  ;;  %v4438_v3 = vld [vmem:[#allocation11 + $0x174] ss:$8 sps:$4 sm:$0xff]  }
 0x42b   : > { %3156 = vmatprep.subr.bf16.mxu0 %v4399_v4  ;;  %v4436_v4 = vld [vmem:[#allocation11 + $0x170] ss:$8 sps:$4 sm:$0xff]  }
 0x42e   : > { %3157 = vmatpush1.bf16.msra.mxu0 %v4397_v5  ;;  %v4441_v5 = vld [vmem:[#allocation11 + $0x184] ss:$8 sps:$4 sm:$0xff]  }
 0x42f   : > { %3158 = vmatprep.subr.bf16.mxu0 %v4402_v6  ;;  %v4439_v6 = vld [vmem:[#allocation11 + $0x180] ss:$8 sps:$4 sm:$0xff]  }
 0x432   : > { %3159 = vmatpush1.bf16.msra.mxu0 %v4400_v7  ;;  %v4444_v7 = vld [vmem:[#allocation11 + $0x194] ss:$8 sps:$4 sm:$0xff]  }
 0x433   : > { %3160 = vmatprep.subr.bf16.mxu0 %v4405_v8  ;;  %v4442_v8 = vld [vmem:[#allocation11 + $0x190] ss:$8 sps:$4 sm:$0xff]  }
 0x436   : > { %3161 = vmatpush1.bf16.msra.mxu0 %v4403_v9  ;;  %v4447_v9 = vld [vmem:[#allocation11 + $0x1a4] ss:$8 sps:$4 sm:$0xff]  }
 0x437   : > { %3162 = vmatprep.subr.bf16.mxu0 %v4408_v10  ;;  %v4445_v10 = vld [vmem:[#allocation11 + $0x1a0] ss:$8 sps:$4 sm:$0xff]  }
 0x43a   : > { %3163 = vmatpush1.bf16.msra.mxu0 %v4406_v11  ;;  %v4450_v11 = vld [vmem:[#allocation11 + $0x1b4] ss:$8 sps:$4 sm:$0xff]  }
 0x43b   : > { %3164 = vmatprep.subr.bf16.mxu0 %v4411_v12  ;;  %v4448_v12 = vld [vmem:[#allocation11 + $0x1b0] ss:$8 sps:$4 sm:$0xff]  }
 0x43e   : > { %3165 = vmatpush1.bf16.msra.mxu0 %v4409_v16  ;;  %v4453_v16 = vld [vmem:[#allocation11 + $0x1c4] ss:$8 sps:$4 sm:$0xff]  }
 0x43f   : > { %3166 = vmatprep.subr.bf16.mxu0 %v4414_v17  ;;  %v4451_v17 = vld [vmem:[#allocation11 + $0x1c0] ss:$8 sps:$4 sm:$0xff]  }
 0x442   : > { %3167 = vmatpush1.bf16.msra.mxu0 %v4412_v36  ;;  %v4456_v36 = vld [vmem:[#allocation11 + $0x1d4] ss:$8 sps:$4 sm:$0xff]  }
 0x443   : > { %3177 = vmatprep.subr.bf16.mxu0 %v4417_v18  ;;  %v4454_v18 = vld [vmem:[#allocation11 + $0x1d0] ss:$8 sps:$4 sm:$0xff]  }
 0x4c8   : > { %v2309_v27 = vpop.f32.mrb[8].mxu0  ;;  %v5293_v29 = vpop.f32.mrb[24].mxu1 }
 0x4c9   : > { %v2310_v30 = vadd.f32 %v2309_v27, %v2095_v20  ;;  %v2311_v32 = vpop.f32.mrb[9].mxu0  ;;  %v2352_v33 = vpop.f32.mrb[25].mxu1  ;;  %v2103_v20 = vrot.slane %v5284_v19, %v655_v56  ;;  %v4457_v27 = vld [vmem:[#allocation11 + $0x1e0] ss:$8 sps:$4 sm:$0xff]  }
 0x4ca   : > { %v2312_v34 = vadd.f32 %v2311_v32, %v2099_v21  ;;  %v2353_v35 = vadd.f32 %v2352_v33, %v2107_v22  ;;  %v2313_v37 = vpop.f32.mrb[10].mxu0  ;;  %v2354_v38 = vpop.f32.mrb[26].mxu1  ;;  %v4459_v21 = vld [vmem:[#allocation11 + $0x1e4] ss:$8 sps:$4 sm:$0xff]   ;;  %v2115_v22 = vrot.slane %v5284_v19, %v667_v15  ;;  %v4462_v32 = vld [vmem:[#allocation11 + $0x1f4] ss:$8 sps:$4 sm:$0xff]  }
 0x4cb   : > { %v2438_v39 = vmax.f32 %v2310_v30, 0.0  ;;  %v2314_v40 = vpop.f32.mrb[11].mxu0  ;;  %v2355_v41 = vpop.f32.mrb[27].mxu1  ;;  %v2351_v30 = vadd.f32 %v5293_v29, %v2103_v20  ;;  %v4465_v37 = vld [vmem:[#allocation11 + $0x204] ss:$8 sps:$4 sm:$0xff]  }
 0x4cc   : > { %v2439_v42 = vmax.f32 %v2312_v34, 0.0  ;;  %v2441_v44 = vmax.f32 %v2353_v35, 0.0  ;;  %v4460_v34 = vld [vmem:[#allocation11 + $0x1f0] ss:$8 sps:$4 sm:$0xff]   ;;  %v4463_v56 = vld [vmem:[#allocation11 + $0x200] ss:$8 sps:$4 sm:$0xff]  }
 0x4cd   : > { %v2445_v47 = vpack.c.bf16 %v2438_v39, %v2438_v39  ;;  %v2440_v35 = vmax.f32 %v2351_v30, 0.0  ;;  %v4468_v40 = vld [vmem:[#allocation11 + $0x214] ss:$8 sps:$4 sm:$0xff]   ;;  %v4466_v15 = vld [vmem:[#allocation11 + $0x210] ss:$8 sps:$4 sm:$0xff]  }
 0x4ce   : > { %v2446_v45 = vpack.c.bf16 %v2439_v42, %v2439_v42  ;;  %v2448_v57 = vpack.c.bf16 %v2441_v44, %v2441_v44  ;;  %v4471_v29 = vld [vmem:[#allocation11 + $0x224] ss:$8 sps:$4 sm:$0xff]   ;;  %v4469_v42 = vld [vmem:[#allocation11 + $0x220] ss:$8 sps:$4 sm:$0xff]   ;;  %v4474_v44 = vld [vmem:[#allocation11 + $0x234] ss:$8 sps:$4 sm:$0xff]  }
 0x4cf   : > { %v2447_v39 = vpack.c.bf16 %v2440_v35, %v2440_v35  ;;  %v4523_v20 = vld [vmem:[#allocation11 + $0x340] ss:$8 sps:$4 sm:$0xff]  }
 0x4d0   : > { %3168 = vmatprep.mubr.bf16.mxu0 %v2446_v45  ;;  %v4472_v45 = vld [vmem:[#allocation11 + $0x230] ss:$8 sps:$4 sm:$0xff]   ;;  %v4529_v30 = vld [vmem:[#allocation11 + $0x360] ss:$8 sps:$4 sm:$0xff]  }
 0x4d1   : > { %3169 = vmatmul.mubr.bf16.vlgmr.msra.gmra.mrb[16].mxu0 %v2445_v47  ;;  %v4475_v47 = vld [vmem:[#allocation11 + $0x240] ss:$8 sps:$4 sm:$0xff]  }
 0x4d2   : > { %3178 = vmatpush1.bf16.msra.mxu0 %v4415_v46  ;;  %3209 = vmatprep.mubr.bf16.mxu0 %v2448_v57  ;;  %v4477_v46 = vld [vmem:[#allocation11 + $0x244] ss:$8 sps:$4 sm:$0xff]   ;;  %v4478_v57 = vld [vmem:[#allocation11 + $0x250] ss:$8 sps:$4 sm:$0xff]  }
 0x4d3   : > { %3179 = vmatprep.subr.bf16.mxu0 %v4420_v48  ;;  %v4480_v48 = vld [vmem:[#allocation11 + $0x254] ss:$8 sps:$4 sm:$0xff]  }
 0x4d6   : > { %3180 = vmatpush1.bf16.msra.mxu0 %v4418_v49  ;;  %v4483_v49 = vld [vmem:[#allocation11 + $0x264] ss:$8 sps:$4 sm:$0xff]  }
 0x4d7   : > { %3181 = vmatprep.subr.bf16.mxu0 %v4423_v50  ;;  %v4481_v50 = vld [vmem:[#allocation11 + $0x260] ss:$8 sps:$4 sm:$0xff]  }
 0x4d8   : > { %v5295_v25 = vpop.f32.mrb[12].mxu0  ;;  %v5297_v53 = vpop.f32.mrb[28].mxu1 }
 0x4d9   : > { %v2393_v54 = vpop.f32.mrb[13].mxu0  ;;  %v3988_v43 = vpop.f32.mrb[29].mxu1 }
 0x4da   : > { %v2395_v55 = vpop.f32.mrb[14].mxu0  ;;  %v2435_v58 = vpop.f32.mrb[30].mxu1  ;;  %3182 = vmatpush1.bf16.msra.mxu0 %v4421_v51  ;;  %v2394_v33 = vadd.f32 %v2393_v54, %v2115_v22  ;;  %v4486_v51 = vld [vmem:[#allocation11 + $0x274] ss:$8 sps:$4 sm:$0xff]   ;;  %v4489_v54 = vld [vmem:[#allocation11 + $0x284] ss:$8 sps:$4 sm:$0xff]  }
 0x4db   : > { %v2396_v60 = vpop.f32.mrb[15].mxu0  ;;  %v3989_v61 = vpop.f32.mrb[31].mxu1  ;;  %3183 = vmatprep.subr.bf16.mxu0 %v4426_v52  ;;  %v4484_v52 = vld [vmem:[#allocation11 + $0x270] ss:$8 sps:$4 sm:$0xff]   ;;  %v4487_v43 = vld [vmem:[#allocation11 + $0x280] ss:$8 sps:$4 sm:$0xff]  }
 0x4dc   : > { %v2443_v38 = vmax.f32 %v2394_v33, 0.0  ;;  %v4492_v55 = vld [vmem:[#allocation11 + $0x294] ss:$8 sps:$4 sm:$0xff]   ;;  %v4490_v58 = vld [vmem:[#allocation11 + $0x290] ss:$8 sps:$4 sm:$0xff]  }
 0x4dd   : > { %v4493_v60 = vld [vmem:[#allocation11 + $0x2a0] ss:$8 sps:$4 sm:$0xff]   ;;  %v4498_v61 = vld [vmem:[#allocation11 + $0x2b4] ss:$8 sps:$4 sm:$0xff]   ;;  %v4526_v22 = vld [vmem:[#allocation11 + $0x350] ss:$8 sps:$4 sm:$0xff]  }
 0x4de   : > { %3184 = vmatpush1.bf16.msra.mxu0 %v4424_v59  ;;  %v2450_v41 = vpack.c.bf16 %v2443_v38, %v2443_v38  ;;  %v4495_v59 = vld [vmem:[#allocation11 + $0x2a4] ss:$8 sps:$4 sm:$0xff]   ;;  %v4534_v33 = vld [vmem:[#allocation11 + $0x374] ss:$8 sps:$4 sm:$0xff]  }
 0x4df   : > { %3185 = vmatprep.subr.bf16.mxu0 %v4429_v62  ;;  %v4496_v62 = vld [vmem:[#allocation11 + $0x2b0] ss:$8 sps:$4 sm:$0xff]  }
 0x4e2   : > { %3186 = vmatpush1.bf16.msra.mxu0 %v4427_v63  ;;  %v4501_v63 = vld [vmem:[#allocation11 + $0x2c4] ss:$8 sps:$4 sm:$0xff]  }
 0x4e3   : > { %3187 = vmatprep.subr.bf16.mxu0 %v4432_v14  ;;  %v4499_v14 = vld [vmem:[#allocation11 + $0x2c0] ss:$8 sps:$4 sm:$0xff]  }
 0x4e6   : > { %3188 = vmatpush1.bf16.msra.mxu0 %v4430_v0  ;;  %v4504_v0 = vld [vmem:[#allocation11 + $0x2d4] ss:$8 sps:$4 sm:$0xff]  }
 0x4e7   : > { %3189 = vmatprep.subr.bf16.mxu0 %v4435_v1  ;;  %v4502_v1 = vld [vmem:[#allocation11 + $0x2d0] ss:$8 sps:$4 sm:$0xff]  }
 0x4ea   : > { %3190 = vmatpush1.bf16.msra.mxu0 %v4433_v2  ;;  %v2111_v2 = vrot.slane %v5284_v19, %v663_v13  ;;  %v4514_v13 = vld [vmem:[#allocation11 + $0x310] ss:$8 sps:$4 sm:$0xff]  }
 0x4eb   : > { %3191 = vmatprep.subr.bf16.mxu0 %v4438_v3  ;;  %v4507_v3 = vld [vmem:[#allocation11 + $0x2e4] ss:$8 sps:$4 sm:$0xff]  }
 0x4ee   : > { %3192 = vmatpush1.bf16.msra.mxu0 %v4436_v4  ;;  %v4505_v4 = vld [vmem:[#allocation11 + $0x2e0] ss:$8 sps:$4 sm:$0xff]  }
 0x4ef   : > { %3193 = vmatprep.subr.bf16.mxu0 %v4441_v5  ;;  %v2392_v5 = vadd.f32 %v5295_v25, %v2111_v2  ;;  %v4517_v25 = vld [vmem:[#allocation11 + $0x320] ss:$8 sps:$4 sm:$0xff]  }
 0x4f2   : > { %3194 = vmatpush1.bf16.msra.mxu0 %v4439_v6  ;;  %v4510_v6 = vld [vmem:[#allocation11 + $0x2f4] ss:$8 sps:$4 sm:$0xff]  }
 0x4f3   : > { %3195 = vmatprep.subr.bf16.mxu0 %v4444_v7  ;;  %v4508_v7 = vld [vmem:[#allocation11 + $0x2f0] ss:$8 sps:$4 sm:$0xff]  }
 0x4f6   : > { %3196 = vmatpush1.bf16.msra.mxu0 %v4442_v8  ;;  %v2442_v8 = vmax.f32 %v2392_v5, 0.0 }
 0x4f7   : > { %3197 = vmatprep.subr.bf16.mxu0 %v4447_v9  ;;  %v4513_v9 = vld [vmem:[#allocation11 + $0x304] ss:$8 sps:$4 sm:$0xff]  }
 0x4fa   : > { %3198 = vmatpush1.bf16.msra.mxu0 %v4445_v10  ;;  %v4511_v10 = vld [vmem:[#allocation11 + $0x300] ss:$8 sps:$4 sm:$0xff]  }
 0x4fb   : > { %3199 = vmatprep.subr.bf16.mxu0 %v4450_v11  ;;  %v2449_v11 = vpack.c.bf16 %v2442_v8, %v2442_v8 }
 0x4fe   : > { %3200 = vmatpush1.bf16.msra.mxu0 %v4448_v12  ;;  %v4516_v12 = vld [vmem:[#allocation11 + $0x314] ss:$8 sps:$4 sm:$0xff]  }
 0x4ff   : > { %3201 = vmatprep.subr.bf16.mxu0 %v4453_v16  ;;  %v4519_v16 = vld [vmem:[#allocation11 + $0x324] ss:$8 sps:$4 sm:$0xff]  }
 0x502   : > { %3202 = vmatpush1.bf16.msra.mxu0 %v4451_v17  ;;  %v4522_v17 = vld [vmem:[#allocation11 + $0x334] ss:$8 sps:$4 sm:$0xff]  }
 0x503   : > { %3203 = vmatprep.subr.bf16.mxu0 %v4456_v36  ;;  %v4520_v36 = vld [vmem:[#allocation11 + $0x330] ss:$8 sps:$4 sm:$0xff]  }
 0x506   : > { %3204 = vmatpush1.bf16.msra.mxu0 %v4454_v18  ;;  %v4525_v18 = vld [vmem:[#allocation11 + $0x344] ss:$8 sps:$4 sm:$0xff]  }
 0x507   : > { %3205 = vmatprep.subr.bf16.mxu0 %v4459_v21  ;;  %v4528_v21 = vld [vmem:[#allocation11 + $0x354] ss:$8 sps:$4 sm:$0xff]  }
 0x50a   : > { %3206 = vmatpush1.bf16.msra.mxu0 %v4457_v27  ;;  %v4531_v27 = vld [vmem:[#allocation11 + $0x364] ss:$8 sps:$4 sm:$0xff]  }
 0x50b   : > { %3207 = vmatprep.subr.bf16.mxu0 %v4462_v32 }
 0x50e   : > { %3208 = vmatpush1.bf16.msra.mxu0 %v4460_v34  ;;  %v4532_v34 = vld [vmem:[#allocation11 + $0x370] ss:$8 sps:$4 sm:$0xff]  }
 0x50f   : > { %3218 = vmatprep.subr.bf16.mxu0 %v4465_v37 }
 0x511   : > { %3210 = vmatmul.mubr.bf16.vlgmr.msra.gmra.mrb[16].mxu0 %v2447_v39 }
 0x512   : > { %3219 = vmatpush1.bf16.msra.mxu0 %v4463_v56  ;;  %3250 = vmatprep.mubr.bf16.mxu0 %v2450_v41 }
 0x513   : > { %3220 = vmatprep.subr.bf16.mxu0 %v4468_v40 }
 0x516   : > { %3221 = vmatpush1.bf16.msra.mxu0 %v4466_v15 }
 0x517   : > { %3222 = vmatprep.subr.bf16.mxu0 %v4471_v29 }
 0x51a   : > { %3223 = vmatpush1.bf16.msra.mxu0 %v4469_v42 }
 0x51b   : > { %3224 = vmatprep.subr.bf16.mxu0 %v4474_v44 }
 0x51e   : > { %3225 = vmatpush1.bf16.msra.mxu0 %v4472_v45 }
 0x51f   : > { %3226 = vmatprep.subr.bf16.mxu0 %v4477_v46 }
 0x522   : > { %3227 = vmatpush1.bf16.msra.mxu0 %v4475_v47 }
 0x523   : > { %3228 = vmatprep.subr.bf16.mxu0 %v4480_v48 }
 0x526   : > { %3229 = vmatpush1.bf16.msra.mxu0 %v4478_v57 }
 0x527   : > { %3230 = vmatprep.subr.bf16.mxu0 %v4483_v49 }
 0x52a   : > { %3231 = vmatpush1.bf16.msra.mxu0 %v4481_v50 }
 0x52b   : > { %3232 = vmatprep.subr.bf16.mxu0 %v4486_v51 }
 0x52e   : > { %3233 = vmatpush1.bf16.msra.mxu0 %v4484_v52 }
 0x52f   : > { %3234 = vmatprep.subr.bf16.mxu0 %v4489_v54 }
 0x532   : > { %3235 = vmatpush1.bf16.msra.mxu0 %v4487_v43 }
 0x533   : > { %3236 = vmatprep.subr.bf16.mxu0 %v4492_v55 }
 0x536   : > { %3237 = vmatpush1.bf16.msra.mxu0 %v4490_v58 }
 0x537   : > { %3238 = vmatprep.subr.bf16.mxu0 %v4495_v59 }
 0x53a   : > { %3239 = vmatpush1.bf16.msra.mxu0 %v4493_v60 }
 0x53b   : > { %3240 = vmatprep.subr.bf16.mxu0 %v4498_v61 }
 0x53e   : > { %3241 = vmatpush1.bf16.msra.mxu0 %v4496_v62 }
 0x53f   : > { %3242 = vmatprep.subr.bf16.mxu0 %v4501_v63 }
 0x542   : > { %3243 = vmatpush1.bf16.msra.mxu0 %v4499_v14 }
 0x543   : > { %3244 = vmatprep.subr.bf16.mxu0 %v4504_v0 }
 0x546   : > { %3245 = vmatpush1.bf16.msra.mxu0 %v4502_v1 }
 0x547   : > { %3246 = vmatprep.subr.bf16.mxu0 %v4507_v3 }
 0x54a   : > { %3247 = vmatpush1.bf16.msra.mxu0 %v4505_v4 }
 0x54b   : > { %3248 = vmatprep.subr.bf16.mxu0 %v4510_v6 }
 0x54e   : > { %3249 = vmatpush1.bf16.msra.mxu0 %v4508_v7 }
 0x54f   : > { %3259 = vmatprep.subr.bf16.mxu0 %v4513_v9 }
 0x551   : > { %3251 = vmatmul.mubr.bf16.vlgmr.msra.gmra.mrb[16].mxu0 %v2449_v11 }
 0x552   : > { %3260 = vmatpush1.bf16.msra.mxu0 %v4511_v10  ;;  %3291 = vmatprep.mubr.bf16.mxu0 %v4847_v28  ;;  %v2119_v28 = vrot.slane %v5284_v19, %v671_v31 }
 0x553   : > { %3261 = vmatprep.subr.bf16.mxu0 %v4516_v12 }
 0x554   : > { %v2433_v32 = vadd.f32 %v5297_v53, %v2119_v28 }
 0x556   : > { %3262 = vmatpush1.bf16.msra.mxu0 %v4514_v13  ;;  %v2444_v35 = vmax.f32 %v2433_v32, 0.0 }
 0x557   : > { %3263 = vmatprep.subr.bf16.mxu0 %v4519_v16 }
 0x558   : > { %v2451_v23 = vpack.c.bf16 %v2444_v35, %v2444_v35 }
 0x55a   : > { %3264 = vmatpush1.bf16.msra.mxu0 %v4517_v25 }
 0x55b   : > { %3265 = vmatprep.subr.bf16.mxu0 %v4522_v17 }
 0x55e   : > { %3266 = vmatpush1.bf16.msra.mxu0 %v4520_v36 }
 0x55f   : > { %3267 = vmatprep.subr.bf16.mxu0 %v4525_v18 }
 0x562   : > { %3268 = vmatpush1.bf16.msra.mxu0 %v4523_v20 }
 0x563   : > { %3269 = vmatprep.subr.bf16.mxu0 %v4528_v21 }
 0x566   : > { %3270 = vmatpush1.bf16.msra.mxu0 %v4526_v22 }
 0x567   : > { %3271 = vmatprep.subr.bf16.mxu0 %v4531_v27 }
 0x56a   : > { %3272 = vmatpush1.bf16.msra.mxu0 %v4529_v30 }
 0x56b   : > { %3273 = vmatprep.subr.bf16.mxu0 %v4534_v33 }
 0x56e   : > { %3274 = vmatpush1.bf16.msra.mxu0 %v4532_v34 }
 0x571   : > { %3292 = vmatmul.mubr.bf16.vlgmr.msra.gmra.mrb[16].mxu0 %v2451_v23 }
 0x572   : > { %4730 = shalt.err (!%p4727_p6)
}
 0x573   : > { %s4731_s29 = scalar_lea.hbm %s5320_s14, 128  ;;  %s4735_s30 = scalar_lea.hbm %s5444_s24, 256 }
 0x574   : > { %p4732_p4 = scmp.ne.s32.totalorder %s5320_s14, %s4731_s29  ;;  %p4736_p10 = scmp.lt.u32.totalorder %s5320_s14, %s5444_s24 }
 0x575   : > { %p4737_p1 = scmp.lt.u32.totalorder %s4735_s30, %s4731_s29  ;;  %p4739_p12 = scmp.lt.u32.totalorder %s4731_s29, %s5320_s14 }
 0x576   : > { %p4733_p8 = pnand %p4732_p4, %p5445_p13 }
 0x577   : > { %p4738_p11 = por %p4737_p1, %p4736_p10 }
 0x578   : > { %p4734_p5 = pneg %p4733_p8 }
 0x579   : > { %p4740_p7 = por %p4739_p12, %p4738_p11 }
 0x57b   : > { %p4741_p9 = pnand %p4740_p7, %p4734_p5 }
 0x57d   : > { %4744 = shalt.err (!%p4741_p9)
}
 0x57e   : > { %4025 = dma.vmem_to_hbm [thread:$0]  (%p5445_p13), %s3349_s26, 128, %s5320_s14, %s3321_s11  }
 0x57f   : > { %s5446_s16 = sld [smem:[#allocation27_spill]]  ;;  %s3855_s26 = sshll.u32 %s4932_s23, 8 }
 0x580   : > { %s501_s14 = scalar_lea.vmem [#allocation13], %s3524_s4  ;;  %s5447_s29 = sld [smem:[#allocation28_spill]] }
 0x581   : > { %s3335_s11 = sshll.u32 %s501_s14, 4  ;;  %s3316_s27 = scalar_lea.sflag [#allocation4], %s5164_s6  ;;  %s5353_s11 = int_to_ptr.vmem [resolvable:$true] %s3335_s11 }
 0x582   : > { %s4745_s30 = scalar_lea.vmem %s5353_s11, 256  ;;  %s4850_s23 = smov [#allocation13]  }
 0x583   : > { %p4746_p0 = scmp.ne.s32.totalorder %s5353_s11, %s4745_s30  ;;  %s4749_s4 = sshll.u32 %s4850_s23, 4  ;;  %s4750_s4 = int_to_ptr.vmem [resolvable:$false] %s4749_s4 }
 0x584   : > { %s4751_s15 = scalar_lea.vmem %s4750_s4, 512  ;;  %p4752_p6 = scmp.lt.s32.totalorder %s5353_s11, %s4750_s4 }
 0x585   : > { %v2564_v31 = vld [vmem:[%s5446_s16] sm:$0x3]  ;;  %p4747_p2 = pnand %p4746_p0, %p5445_p13  ;;  %p4753_p4 = scmp.lt.s32.totalorder %s4751_s15, %s4745_s30 }
 0x586   : > { %v2569_v19 = vrot.slane %v2564_v31, %v5215_v24  ;;  %v2573_v53 = vrot.slane %v2564_v31, %v5223_v26  ;;  %s5351_s2 = scalar_lea.hbm %s5447_s29, %s3855_s26 }
 0x587   : > { %p4748_p3 = pneg %p4747_p2  ;;  %p4754_p8 = por %p4753_p4, %p4752_p6 }
 0x589   : > { %p4755_p5 = pnand %p4754_p8, %p4748_p3 }
 0x644   : > { %v3293_v37 = vpop.f32.mrb[16].mxu0 }
 0x645   : > { %v3990_v38 = vadd.f32 %v3293_v37, %v2569_v19  ;;  %v3295_v56 = vpop.f32.mrb[17].mxu0 }
 0x646   : > { %v3991_v39 = vadd.f32 %v3295_v56, %v2573_v53  ;;  %v3297_v40 = vpop.f32.mrb[18].mxu0 }
 0x647   : > { %v3845_v41 = vmul.f32 -1.442695, %v3990_v38  ;;  %v3298_v15 = vpop.f32.mrb[19].mxu0 }
 0x648   : > { %v3846_v29 = vmul.f32 -1.442695, %v3991_v39 }
 0x649   : > { %4537 = vpow2.f32 %v3845_v41 }
 0x64a   : > { %4539 = vpow2.f32 %v3846_v29 }
 0x653   : > { %v4538_v42 = vpop.eup %4537 }
 0x654   : > { %v4540_v44 = vpop.eup %4539  ;;  %v3306_v45 = vadd.f32 1.0, %v4538_v42 }
 0x655   : > { %v3307_v24 = vadd.f32 1.0, %v4540_v44 }
 0x656   : > { %4541 = vrcp.f32 %v3306_v45 }
 0x657   : > { %4543 = vrcp.f32 %v3307_v24 }
 0x660   : > { %v4542_v26 = vpop.eup %4541 }
 0x661   : > { %v4544_v46 = vpop.eup %4543  ;;  %3312 = vst [vmem:[%s501_s14] sm:$0xff] %v4542_v26 }
 0x662   : > { %3313 = vst [vmem:[%s501_s14 + $0x8] sm:$0xff] %v4544_v46 }
 0x663   : > { %4758 = shalt.err (!%p4755_p5)
}
 0x664   : > { %s4759_s6 = scalar_lea.hbm %s5351_s2, 256  ;;  %s4763_s13 = scalar_lea.hbm %s5447_s29, 512 }
 0x665   : > { %p4760_p10 = scmp.ne.s32.totalorder %s5351_s2, %s4759_s6  ;;  %p4764_p12 = scmp.lt.u32.totalorder %s5351_s2, %s5447_s29 }
 0x666   : > { %p4765_p7 = scmp.lt.u32.totalorder %s4763_s13, %s4759_s6  ;;  %p4767_p0 = scmp.lt.u32.totalorder %s4759_s6, %s5351_s2 }
 0x667   : > { %p4761_p1 = pnand %p4760_p10, %p5445_p13 }
 0x668   : > { %p4766_p9 = por %p4765_p7, %p4764_p12 }
 0x669   : > { %p4762_p11 = pneg %p4761_p1 }
 0x66a   : > { %p4768_p2 = por %p4767_p0, %p4766_p9 }
 0x66c   : > { %p4769_p3 = pnand %p4768_p2, %p4762_p11 }
 0x66e   : > { %4772 = shalt.err (!%p4769_p3)
}
 0x66f   : > { %4024 = dma.vmem_to_hbm [thread:$0]  (%p5445_p13), %s5353_s11, 256, %s5351_s2, %s3316_s27  }
 0x670 PF: > { %s3360_s14 = sand.u32 1, %s4819_s17   ;;  %p5448_p6 = scmp.ne.s32.totalorder %s5432_s22, 0 }
 0x671   : > { %p5449_p4 = scmp.ge.s32.totalorder %s4831_s20, 2  ;;  %s3361_s12 = scalar_lea.sflag [#allocation4], %s3360_s14 }
 0x673   : > { %p4049_p8 = pnand %p5449_p4, %p5448_p6 }
 0x675   : > { %4810 = dma.done.wait (!%p4049_p8), %s3361_s12, 256  }
 0x676   : > { %4812 = vsyncadd (!%p4049_p8), %s3361_s12, 4294967040  ;;  %s3370_s25 = scalar_lea.sflag [#allocation15], %s3360_s14 }
 0x677   : > { %4814 = dma.done.wait (!%p4049_p8), %s3370_s25, 128  }
 0x678   : > { %4816 = vsyncadd (!%p4049_p8), %s3370_s25, 4294967168  ;;  %p33_p13 = scmp.ge.s32.totalorder %s5053_s9, 4   ;;  %s5450_s17 = smov %s4823_s18 }
 0x679   : > { %s5451_s18 = smov %s4827_s19  ;;  %s5452_s19 = smov %s5064_s21 }
 0x67a   : > { %s5453_s20 = smov %s5053_s9  ;;  %35 = sbr.rel (!%p33_p13) target bundleno = 19 (0x13), region = 151 }
 0x681   :  { %3375 = vsyncpa [#allocation3], 1 }
 0x682   :  { %3377 = vsyncpa [#allocation3 + $0x1], 1 }
 0x683   :  { %3378 = vsyncpa [#allocation6], 1 }
 0x684   :  { %3380 = vsyncpa [#allocation6 + $0x1], 1 }
 0x685   :  { %3381 = vsyncpa [#allocation9], 1 }
 0x686   :  { %3382 = vsyncpa [#allocation12], 1 }
 0x687   :  { %3383 = vsyncpa [#allocation4], 1 }
 0x688   :  { %3385 = vsyncpa [#allocation4 + $0x1], 1 }
 0x689   :  { %3386 = vsyncpa [#allocation15], 1 }
 0x68a   :  { %3388 = vsyncpa [#allocation15 + $0x1], 1 }

</bundles_post_ra>
